<compile_context>
chip_gen: v5e
topology: v5e:2x2
jax: 0.10.0
libtpu: 0.0.40
codegen_flags: <defaults>
</compile_context>

<pallas_src>
import jax
import jax.numpy as jnp
import numpy as np
from jax import lax
from jax.experimental import pallas as pl
from jax.experimental.pallas import tpu as pltpu


# ----------------------------------------------------------------------------
# In-kernel helper: 3x3 conv + bias + ReLU as 9 accumulating MXU taps.
#   src_ref: (B, Ho+2, Wo+4, C) zero-halo activation; interior at [1:Ho+1, 2:Wo+2]
#            (interior starts at sublane offset 2 so bf16-packed stores stay
#             word-aligned; logical padded column j lives at scratch column j+1).
#   w_ref  : (9, C, Co)  per-(dh, dw) tap weights      b_ref: (1, Co)
# ----------------------------------------------------------------------------
def _conv3x3_relu_taps(src_ref, w_ref, b_ref, Ho, Wo, M):
    C = src_ref.shape[-1]
    acc = None
    for dh in range(3):
        for dw in range(3):
            tap = src_ref[:, pl.ds(dh, Ho), pl.ds(dw + 1, Wo), :].reshape(M, C)
            part = jnp.dot(tap, w_ref[dh * 3 + dw],
                           preferred_element_type=jnp.float32)
            acc = part if acc is None else acc + part
    return jnp.maximum(acc + b_ref[...].astype(jnp.float32), 0.0)


# ----------------------------------------------------------------------------
# Fused StridedDown kernel: B images per grid step, all stages in VMEM.
# ----------------------------------------------------------------------------
def _strided_down_kernel(x_ref, w1_ref, b1_ref, w2_ref, b2_ref, w3_ref, b3_ref,
                         o_ref, s1_ref, s2_ref):
    # x_ref : (B, Ho, 2, Wo, 2*Ci)  stride-2 view of NHWC input (kh split out,
    #                               last dim ordered (kw, ci))
    # w1_ref: (2, 2*Ci, Ci)  w2_ref: (9, Ci, Co)  w3_ref: (9, Co, CoPad)
    # o_ref : (B, Ho*Wo, CoPad)     lane-dense output block
    # s1/s2 : (B, Ho+2, Wo+4, C)    zero-halo activations (VMEM scratch)
    B, Ho, _, Wo, _ = x_ref.shape
    M = B * Ho * Wo
    cdt = s1_ref.dtype

    # ---- zero ONLY the 1-wide padding ring (interior fully overwritten) -----
    # Done every step (no program_id gating) so megacore grid sharding is safe.
    for s_ref in (s1_ref, s2_ref):
        _, Hp, Wp, C = s_ref.shape
        zr = jnp.zeros((B, 1, Wp, C), cdt)
        zc = jnp.zeros((B, Hp, 1, C), cdt)
        s_ref[:, pl.ds(0, 1), :, :] = zr           # top padding row
        s_ref[:, pl.ds(Ho + 1, 1), :, :] = zr      # bottom padding row
        s_ref[:, :, pl.ds(1, 1), :] = zc           # left padding col (logical 0)
        s_ref[:, :, pl.ds(Wo + 2, 1), :] = zc      # right padding col (logical Wo+1)

    # ---- stage 1: 2x2 / stride-2 conv as 2 accumulating taps (no activation)
    acc = None
    for kh in range(2):
        tap = x_ref[:, :, pl.ds(kh, 1), :, :].reshape(M, x_ref.shape[-1])
        part = jnp.dot(tap, w1_ref[kh], preferred_element_type=jnp.float32)
        acc = part if acc is None else acc + part
    h1 = acc + b1_ref[...].astype(jnp.float32)
    s1_ref[:, pl.ds(1, Ho), pl.ds(2, Wo), :] = (
        h1.reshape(B, Ho, Wo, -1).astype(cdt))

    # ---- stage 2: 3x3 conv + ReLU -------------------------------------------
    h2 = _conv3x3_relu_taps(s1_ref, w2_ref, b2_ref, Ho, Wo, M)
    s2_ref[:, pl.ds(1, Ho), pl.ds(2, Wo), :] = (
        h2.reshape(B, Ho, Wo, -1).astype(cdt))

    # ---- stage 3: 3x3 conv + ReLU, lane-dense direct store ------------------
    h3 = _conv3x3_relu_taps(s2_ref, w3_ref, b3_ref, Ho, Wo, M)
    o_ref[...] = h3.reshape(B, Ho * Wo, -1).astype(o_ref.dtype)


def _padded_bytes(shape, dtype):
    """Approximate VMEM footprint of an array with (8,128) minor-dim tiling."""
    shape = list(shape) if len(shape) >= 2 else [1] + list(shape)
    lane = -(-shape[-1] // 128) * 128
    sub = -(-shape[-2] // 8) * 8
    lead = 1
    for d in shape[:-2]:
        lead *= int(d)
    return lead * sub * lane * np.dtype(dtype).itemsize


# ----------------------------------------------------------------------------
# StridedDown forward (NCHW in / NCHW out, PyTorch convention)
# ----------------------------------------------------------------------------
def strided_down_forward(x_nchw, params, *, compute_dtype=jnp.float32,
                         images_per_block=None):
    N, Ci, H, W = x_nchw.shape
    assert H % 2 == 0 and W % 2 == 0, "StridedDown kernel requires even H, W"
    Ho, Wo = H // 2, W // 2
    # Keeps all in-kernel reshapes sublane-trivial (no relayout lowering risk).
    assert Wo % 8 == 0, "kernel assumes W//2 is a multiple of 8"
    Co = int(params["b3"].shape[0])
    co_pad = -(-Co // 128) * 128           # lane-dense output width (no-op if Co%128==0)

    if images_per_block is None:
        # Grow per-step batch until the matmul M dim (B*Ho*Wo) reaches ~256;
        # large N still leaves many grid steps for megacore / pipelining.
        images_per_block = 1
        for b in range(1, N + 1):
            if N % b == 0 and b * Ho * Wo <= max(256, Ho * Wo):
                images_per_block = b
    B = images_per_block
    assert N % B == 0
    grid = (N // B,)

    # NCHW -> NHWC (the one unavoidable relayout for channels-last MXU compute),
    # then a FREE contiguous reshape exposing the stride-2 structure; the 2x2
    # patch gather itself happens inside the kernel.
    # TODO(synk): if the surrounding model keeps activations NHWC, pass them
    # straight through and drop this transpose entirely.
    x_nhwc = jnp.transpose(x_nchw, (0, 2, 3, 1)).astype(compute_dtype)
    xv = x_nhwc.reshape(N, Ho, 2, Wo, 2 * Ci)

    w1k = params["w1_taps"].astype(compute_dtype)              # (2, 2*Ci, Ci)
    w2k = params["w2_taps"].astype(compute_dtype)              # (9, Ci, Co)
    w3k = jnp.pad(params["w3_taps"],                           # (9, Co, co_pad)
                  ((0, 0), (0, 0), (0, co_pad - Co))).astype(compute_dtype)
    b1 = params["b1"].reshape(1, Ci).astype(jnp.float32)
    b2 = params["b2"].reshape(1, Co).astype(jnp.float32)
    b3 = jnp.pad(params["b3"], (0, co_pad - Co)).reshape(1, co_pad).astype(jnp.float32)

    # VMEM budget: scratch + 2x (double-buffered) input/output blocks + weights.
    scratch_bytes = (_padded_bytes((B, Ho + 2, Wo + 4, Ci), compute_dtype)
                     + _padded_bytes((B, Ho + 2, Wo + 4, Co), compute_dtype))
    io_bytes = 2 * (_padded_bytes((B, Ho, 2, Wo, 2 * Ci), compute_dtype)
                    + _padded_bytes((B, Ho * Wo, co_pad), jnp.float32))
    w_bytes = 2 * sum(_padded_bytes(a.shape, a.dtype)
                      for a in (w1k, b1, w2k, b2, w3k, b3))
    # Cap v7x-safe at 48 MiB (64 MiB physical); v5e/v6e could raise toward 100 MiB.
    vmem_limit = int(min(max(2 * (scratch_bytes + io_bytes + w_bytes),
                             8 * 1024 * 1024), 48 * 1024 * 1024))

    # TODO(synk): for large H, W add a spatial row-tile grid axis (1-row halo
    # recompute) so scratch fits v7x's 64 MiB VMEM and both TCs stay fed even
    # at small N; full-image-per-step is appropriate at these shapes.
    out = pl.pallas_call(
        _strided_down_kernel,
        out_shape=jax.ShapeDtypeStruct((N, Ho * Wo, co_pad), jnp.float32),
        grid_spec=pltpu.PrefetchScalarGridSpec(
            num_scalar_prefetch=0,
            grid=grid,
            in_specs=[
                pl.BlockSpec((B, Ho, 2, Wo, 2 * Ci), lambda n: (n, 0, 0, 0, 0)),
                pl.BlockSpec((2, 2 * Ci, Ci), lambda n: (0, 0, 0)),
                pl.BlockSpec((1, Ci), lambda n: (0, 0)),
                pl.BlockSpec((9, Ci, Co), lambda n: (0, 0, 0)),
                pl.BlockSpec((1, Co), lambda n: (0, 0)),
                pl.BlockSpec((9, Co, co_pad), lambda n: (0, 0, 0)),
                pl.BlockSpec((1, co_pad), lambda n: (0, 0)),
            ],
            out_specs=pl.BlockSpec((B, Ho * Wo, co_pad), lambda n: (n, 0, 0)),
            scratch_shapes=[
                pltpu.VMEM((B, Ho + 2, Wo + 4, Ci), compute_dtype),  # stage-1 act + halo
                pltpu.VMEM((B, Ho + 2, Wo + 4, Co), compute_dtype),  # stage-2 act + halo
            ],
        ),
        compiler_params=pltpu.CompilerParams(
            dimension_semantics=("parallel",),
            vmem_limit_bytes=vmem_limit,
        ),
    )(xv, w1k, b1, w2k, b2, w3k, b3)

    # Drop the zero lane-pad channels; small relayout on the downsampled output.
    return out[:, :, :Co].reshape(N, Ho, Wo, Co).transpose(0, 3, 1, 2)


def init_params(key, cin, cout):
    ks = jax.random.split(key, 6)
    # PyTorch Conv2d weight layout: (O, I, kH, kW)
    w1 = jax.random.normal(ks[0], (cin, cin, 2, 2), jnp.float32) * 0.2
    b1 = jax.random.normal(ks[1], (cin,), jnp.float32) * 0.1
    w2 = jax.random.normal(ks[2], (cout, cin, 3, 3), jnp.float32) * 0.2
    b2 = jax.random.normal(ks[3], (cout,), jnp.float32) * 0.1
    w3 = jax.random.normal(ks[4], (cout, cout, 3, 3), jnp.float32) * 0.2
    b3 = jax.random.normal(ks[5], (cout,), jnp.float32) * 0.1
    params = {
        # 2x2/stride-2 conv as 2 per-kh taps: rows ordered (kw, ci)
        "w1_taps": jnp.transpose(w1, (2, 3, 1, 0)).reshape(2, 2 * cin, cin),
        "b1": b1,
        # 3x3 convs as 9 per-(dh,dw) taps: (tap, ci, co)
        "w2_taps": jnp.transpose(w2, (2, 3, 1, 0)).reshape(9, cin, cout),
        "b2": b2,
        "w3_taps": jnp.transpose(w3, (2, 3, 1, 0)).reshape(9, cout, cout),
        "b3": b3,
    }
    torch_layout = (w1, b1, w2, b2, w3, b3)
    return params, torch_layout


def reference_forward(x, w1, b1, w2, b2, w3, b3):
    dn = ("NCHW", "OIHW", "NCHW")
    y = lax.conv_general_dilated(x, w1, (2, 2), "VALID", dimension_numbers=dn)
    y = y + b1[None, :, None, None]
    y = lax.conv_general_dilated(y, w2, (1, 1), ((1, 1), (1, 1)),
                                 dimension_numbers=dn)
    y = jnp.maximum(y + b2[None, :, None, None], 0.0)
    y = lax.conv_general_dilated(y, w3, (1, 1), ((1, 1), (1, 1)),
                                 dimension_numbers=dn)
    y = jnp.maximum(y + b3[None, :, None, None], 0.0)
    return y


if __name__ == "__main__":
    key = jax.random.PRNGKey(0)
    kx, kp = jax.random.split(key)

    N, CIN, COUT, H, W = 2, 4, 8, 16, 16
    x = jax.random.normal(kx, (N, CIN, H, W), jnp.float32)

    params, torch_w = init_params(kp, CIN, COUT)

    ref = jax.block_until_ready(reference_forward(x, *torch_w))

    # Exact (f32) compute path.
    out = jax.block_until_ready(strided_down_forward(x, params))
    assert out.shape == (N, COUT, H // 2, W // 2), out.shape
    np.testing.assert_allclose(np.asarray(out), np.asarray(ref),
                               rtol=1e-4, atol=1e-4)

    # bf16 compute path (v6e/v7x MXU rate, half the scratch VMEM) -- validated
    # against the f32 reference with loose tolerances (review correctness item).
    out_bf16 = jax.block_until_ready(
        strided_down_forward(x, params, compute_dtype=jnp.bfloat16))
    np.testing.assert_allclose(np.asarray(out_bf16), np.asarray(ref),
                               rtol=5e-2, atol=5e-2)

    print("KERNEL_OK")
</pallas_src>

<mosaic_0001>
module attributes {stable_mosaic.version = 11 : i64} {
  func.func @_strided_down_kernel(%arg0: i32, %arg1: memref<2x8x2x8x8xf32, #tpu.memory_space<vmem>>, %arg2: memref<2x8x4xf32, #tpu.memory_space<vmem>>, %arg3: memref<1x4xf32, #tpu.memory_space<vmem>>, %arg4: memref<9x4x8xf32, #tpu.memory_space<vmem>>, %arg5: memref<1x8xf32, #tpu.memory_space<vmem>>, %arg6: memref<9x8x128xf32, #tpu.memory_space<vmem>>, %arg7: memref<1x128xf32, #tpu.memory_space<vmem>>, %arg8: memref<2x64x128xf32, #tpu.memory_space<vmem>>, %arg9: memref<2x10x12x4xf32, #tpu.memory_space<vmem>>, %arg10: memref<2x10x12x8xf32, #tpu.memory_space<vmem>>) attributes {dimension_semantics = [#tpu.dimension_semantics<parallel>], iteration_bounds = array<i64: 1>, scalar_prefetch = 0 : i64, scratch_operands = 2 : i64, tpu.core_type = #tpu.core_type<tc>, window_params = [{transform_indices = @transform_0, window_bounds = array<i64: 2, 8, 2, 8, 8>}, {pipeline_mode = #tpu.pipeline_mode<synchronous>, transform_indices = @transform_1, window_bounds = array<i64: 2, 8, 4>}, {pipeline_mode = #tpu.pipeline_mode<synchronous>, transform_indices = @transform_2, window_bounds = array<i64: 1, 4>}, {pipeline_mode = #tpu.pipeline_mode<synchronous>, transform_indices = @transform_3, window_bounds = array<i64: 9, 4, 8>}, {pipeline_mode = #tpu.pipeline_mode<synchronous>, transform_indices = @transform_4, window_bounds = array<i64: 1, 8>}, {pipeline_mode = #tpu.pipeline_mode<synchronous>, transform_indices = @transform_5, window_bounds = array<i64: 9, 8, 128>}, {pipeline_mode = #tpu.pipeline_mode<synchronous>, transform_indices = @transform_6, window_bounds = array<i64: 1, 128>}, {transform_indices = @transform_7, window_bounds = array<i64: 2, 64, 128>}]} {
    %cst = arith.constant 0.000000e+00 : f32
    %0 = vector.broadcast %cst : f32 to vector<2x1x12x4xf32>
    %cst_0 = arith.constant 0.000000e+00 : f32
    %1 = vector.broadcast %cst_0 : f32 to vector<2x10x1x4xf32>
    %c0 = arith.constant 0 : index
    %c0_1 = arith.constant 0 : index
    %c0_2 = arith.constant 0 : index
    %c0_3 = arith.constant 0 : index
    %2 = vector.load %arg9[%c0, %c0_1, %c0_2, %c0_3] : memref<2x10x12x4xf32, #tpu.memory_space<vmem>>, vector<2x1x12x4xf32>
    tpu.vector_store %arg9[%c0, %c0_1, %c0_2, %c0_3], %0 {strides = array<i32>} : memref<2x10x12x4xf32, #tpu.memory_space<vmem>>, vector<2x1x12x4xf32>,
    %c0_4 = arith.constant 0 : index
    %c9 = arith.constant 9 : index
    %c0_5 = arith.constant 0 : index
    %c0_6 = arith.constant 0 : index
    %3 = vector.load %arg9[%c0_4, %c9, %c0_5, %c0_6] : memref<2x10x12x4xf32, #tpu.memory_space<vmem>>, vector<2x1x12x4xf32>
    tpu.vector_store %arg9[%c0_4, %c9, %c0_5, %c0_6], %0 {strides = array<i32>} : memref<2x10x12x4xf32, #tpu.memory_space<vmem>>, vector<2x1x12x4xf32>,
    %c0_7 = arith.constant 0 : index
    %c0_8 = arith.constant 0 : index
    %c1 = arith.constant 1 : index
    %c0_9 = arith.constant 0 : index
    %4 = vector.load %arg9[%c0_7, %c0_8, %c1, %c0_9] : memref<2x10x12x4xf32, #tpu.memory_space<vmem>>, vector<2x10x1x4xf32>
    tpu.vector_store %arg9[%c0_7, %c0_8, %c1, %c0_9], %1 {strides = array<i32>} : memref<2x10x12x4xf32, #tpu.memory_space<vmem>>, vector<2x10x1x4xf32>,
    %c0_10 = arith.constant 0 : index
    %c0_11 = arith.constant 0 : index
    %c10 = arith.constant 10 : index
    %c0_12 = arith.constant 0 : index
    %5 = vector.load %arg9[%c0_10, %c0_11, %c10, %c0_12] : memref<2x10x12x4xf32, #tpu.memory_space<vmem>>, vector<2x10x1x4xf32>
    tpu.vector_store %arg9[%c0_10, %c0_11, %c10, %c0_12], %1 {strides = array<i32>} : memref<2x10x12x4xf32, #tpu.memory_space<vmem>>, vector<2x10x1x4xf32>,
    %cst_13 = arith.constant 0.000000e+00 : f32
    %6 = vector.broadcast %cst_13 : f32 to vector<2x1x12x8xf32>
    %cst_14 = arith.constant 0.000000e+00 : f32
    %7 = vector.broadcast %cst_14 : f32 to vector<2x10x1x8xf32>
    %c0_15 = arith.constant 0 : index
    %c0_16 = arith.constant 0 : index
    %c0_17 = arith.constant 0 : index
    %c0_18 = arith.constant 0 : index
    %8 = vector.load %arg10[%c0_15, %c0_16, %c0_17, %c0_18] : memref<2x10x12x8xf32, #tpu.memory_space<vmem>>, vector<2x1x12x8xf32>
    tpu.vector_store %arg10[%c0_15, %c0_16, %c0_17, %c0_18], %6 {strides = array<i32>} : memref<2x10x12x8xf32, #tpu.memory_space<vmem>>, vector<2x1x12x8xf32>,
    %c0_19 = arith.constant 0 : index
    %c9_20 = arith.constant 9 : index
    %c0_21 = arith.constant 0 : index
    %c0_22 = arith.constant 0 : index
    %9 = vector.load %arg10[%c0_19, %c9_20, %c0_21, %c0_22] : memref<2x10x12x8xf32, #tpu.memory_space<vmem>>, vector<2x1x12x8xf32>
    tpu.vector_store %arg10[%c0_19, %c9_20, %c0_21, %c0_22], %6 {strides = array<i32>} : memref<2x10x12x8xf32, #tpu.memory_space<vmem>>, vector<2x1x12x8xf32>,
    %c0_23 = arith.constant 0 : index
    %c0_24 = arith.constant 0 : index
    %c1_25 = arith.constant 1 : index
    %c0_26 = arith.constant 0 : index
    %10 = vector.load %arg10[%c0_23, %c0_24, %c1_25, %c0_26] : memref<2x10x12x8xf32, #tpu.memory_space<vmem>>, vector<2x10x1x8xf32>
    tpu.vector_store %arg10[%c0_23, %c0_24, %c1_25, %c0_26], %7 {strides = array<i32>} : memref<2x10x12x8xf32, #tpu.memory_space<vmem>>, vector<2x10x1x8xf32>,
    %c0_27 = arith.constant 0 : index
    %c0_28 = arith.constant 0 : index
    %c10_29 = arith.constant 10 : index
    %c0_30 = arith.constant 0 : index
    %11 = vector.load %arg10[%c0_27, %c0_28, %c10_29, %c0_30] : memref<2x10x12x8xf32, #tpu.memory_space<vmem>>, vector<2x10x1x8xf32>
    tpu.vector_store %arg10[%c0_27, %c0_28, %c10_29, %c0_30], %7 {strides = array<i32>} : memref<2x10x12x8xf32, #tpu.memory_space<vmem>>, vector<2x10x1x8xf32>,
    %c0_31 = arith.constant 0 : index
    %c0_32 = arith.constant 0 : index
    %c0_33 = arith.constant 0 : index
    %c0_34 = arith.constant 0 : index
    %c0_35 = arith.constant 0 : index
    %12 = vector.load %arg1[%c0_31, %c0_32, %c0_33, %c0_34, %c0_35] : memref<2x8x2x8x8xf32, #tpu.memory_space<vmem>>, vector<2x8x1x8x8xf32>
    %13 = vector.shape_cast %12 : vector<2x8x1x8x8xf32> to vector<128x8xf32>
    %c0_36 = arith.constant 0 : index
    %c0_37 = arith.constant 0 : index
    %c0_38 = arith.constant 0 : index
    %14 = vector.load %arg2[%c0_36, %c0_37, %c0_38] : memref<2x8x4xf32, #tpu.memory_space<vmem>>, vector<1x8x4xf32>
    %15 = vector.shape_cast %14 : vector<1x8x4xf32> to vector<8x4xf32>
    %cst_39 = arith.constant dense<0.000000e+00> : vector<128x4xf32>
    %16 = tpu.matmul %13, %15, %cst_39 {dimension_numbers = #tpu.dot_dimension_numbers<[1], [0], [0], [1], [0, 0, 1, 1], [], []>} : vector<128x8xf32>, vector<8x4xf32>, vector<128x4xf32> -> vector<128x4xf32>
    %c0_40 = arith.constant 0 : index
    %c0_41 = arith.constant 0 : index
    %c1_42 = arith.constant 1 : index
    %c0_43 = arith.constant 0 : index
    %c0_44 = arith.constant 0 : index
    %17 = vector.load %arg1[%c0_40, %c0_41, %c1_42, %c0_43, %c0_44] : memref<2x8x2x8x8xf32, #tpu.memory_space<vmem>>, vector<2x8x1x8x8xf32>
    %18 = vector.shape_cast %17 : vector<2x8x1x8x8xf32> to vector<128x8xf32>
    %c1_45 = arith.constant 1 : index
    %c0_46 = arith.constant 0 : index
    %c0_47 = arith.constant 0 : index
    %19 = vector.load %arg2[%c1_45, %c0_46, %c0_47] : memref<2x8x4xf32, #tpu.memory_space<vmem>>, vector<1x8x4xf32>
    %20 = vector.shape_cast %19 : vector<1x8x4xf32> to vector<8x4xf32>
    %cst_48 = arith.constant dense<0.000000e+00> : vector<128x4xf32>
    %21 = tpu.matmul %18, %20, %cst_48 {dimension_numbers = #tpu.dot_dimension_numbers<[1], [0], [0], [1], [0, 0, 1, 1], [], []>} : vector<128x8xf32>, vector<8x4xf32>, vector<128x4xf32> -> vector<128x4xf32>
    %22 = arith.addf %16, %21 : vector<128x4xf32>
    %c0_49 = arith.constant 0 : index
    %c0_50 = arith.constant 0 : index
    %23 = vector.load %arg3[%c0_49, %c0_50] : memref<1x4xf32, #tpu.memory_space<vmem>>, vector<1x4xf32>
    %24 = vector.broadcast %23 : vector<1x4xf32> to vector<128x4xf32>
    %25 = arith.addf %22, %24 : vector<128x4xf32>
    %26 = vector.shape_cast %25 : vector<128x4xf32> to vector<2x8x8x4xf32>
    %c0_51 = arith.constant 0 : index
    %c1_52 = arith.constant 1 : index
    %c2 = arith.constant 2 : index
    %c0_53 = arith.constant 0 : index
    %27 = vector.load %arg9[%c0_51, %c1_52, %c2, %c0_53] : memref<2x10x12x4xf32, #tpu.memory_space<vmem>>, vector<2x8x8x4xf32>
    tpu.vector_store %arg9[%c0_51, %c1_52, %c2, %c0_53], %26 {strides = array<i32>} : memref<2x10x12x4xf32, #tpu.memory_space<vmem>>, vector<2x8x8x4xf32>,
    %c0_54 = arith.constant 0 : index
    %c0_55 = arith.constant 0 : index
    %c1_56 = arith.constant 1 : index
    %c0_57 = arith.constant 0 : index
    %28 = vector.load %arg9[%c0_54, %c0_55, %c1_56, %c0_57] : memref<2x10x12x4xf32, #tpu.memory_space<vmem>>, vector<2x8x8x4xf32>
    %29 = vector.shape_cast %28 : vector<2x8x8x4xf32> to vector<128x4xf32>
    %c0_58 = arith.constant 0 : index
    %c0_59 = arith.constant 0 : index
    %c0_60 = arith.constant 0 : index
    %30 = vector.load %arg4[%c0_58, %c0_59, %c0_60] : memref<9x4x8xf32, #tpu.memory_space<vmem>>, vector<1x4x8xf32>
    %31 = vector.shape_cast %30 : vector<1x4x8xf32> to vector<4x8xf32>
    %cst_61 = arith.constant dense<0.000000e+00> : vector<128x8xf32>
    %32 = tpu.matmul %29, %31, %cst_61 {dimension_numbers = #tpu.dot_dimension_numbers<[1], [0], [0], [1], [0, 0, 1, 1], [], []>} : vector<128x4xf32>, vector<4x8xf32>, vector<128x8xf32> -> vector<128x8xf32>
    %c0_62 = arith.constant 0 : index
    %c0_63 = arith.constant 0 : index
    %c2_64 = arith.constant 2 : index
    %c0_65 = arith.constant 0 : index
    %33 = vector.load %arg9[%c0_62, %c0_63, %c2_64, %c0_65] : memref<2x10x12x4xf32, #tpu.memory_space<vmem>>, vector<2x8x8x4xf32>
    %34 = vector.shape_cast %33 : vector<2x8x8x4xf32> to vector<128x4xf32>
    %c1_66 = arith.constant 1 : index
    %c0_67 = arith.constant 0 : index
    %c0_68 = arith.constant 0 : index
    %35 = vector.load %arg4[%c1_66, %c0_67, %c0_68] : memref<9x4x8xf32, #tpu.memory_space<vmem>>, vector<1x4x8xf32>
    %36 = vector.shape_cast %35 : vector<1x4x8xf32> to vector<4x8xf32>
    %cst_69 = arith.constant dense<0.000000e+00> : vector<128x8xf32>
    %37 = tpu.matmul %34, %36, %cst_69 {dimension_numbers = #tpu.dot_dimension_numbers<[1], [0], [0], [1], [0, 0, 1, 1], [], []>} : vector<128x4xf32>, vector<4x8xf32>, vector<128x8xf32> -> vector<128x8xf32>
    %38 = arith.addf %32, %37 : vector<128x8xf32>
    %c0_70 = arith.constant 0 : index
    %c0_71 = arith.constant 0 : index
    %c3 = arith.constant 3 : index
    %c0_72 = arith.constant 0 : index
    %39 = vector.load %arg9[%c0_70, %c0_71, %c3, %c0_72] : memref<2x10x12x4xf32, #tpu.memory_space<vmem>>, vector<2x8x8x4xf32>
    %40 = vector.shape_cast %39 : vector<2x8x8x4xf32> to vector<128x4xf32>
    %c2_73 = arith.constant 2 : index
    %c0_74 = arith.constant 0 : index
    %c0_75 = arith.constant 0 : index
    %41 = vector.load %arg4[%c2_73, %c0_74, %c0_75] : memref<9x4x8xf32, #tpu.memory_space<vmem>>, vector<1x4x8xf32>
    %42 = vector.shape_cast %41 : vector<1x4x8xf32> to vector<4x8xf32>
    %cst_76 = arith.constant dense<0.000000e+00> : vector<128x8xf32>
    %43 = tpu.matmul %40, %42, %cst_76 {dimension_numbers = #tpu.dot_dimension_numbers<[1], [0], [0], [1], [0, 0, 1, 1], [], []>} : vector<128x4xf32>, vector<4x8xf32>, vector<128x8xf32> -> vector<128x8xf32>
    %44 = arith.addf %38, %43 : vector<128x8xf32>
    %c0_77 = arith.constant 0 : index
    %c1_78 = arith.constant 1 : index
    %c1_79 = arith.constant 1 : index
    %c0_80 = arith.constant 0 : index
    %45 = vector.load %arg9[%c0_77, %c1_78, %c1_79, %c0_80] : memref<2x10x12x4xf32, #tpu.memory_space<vmem>>, vector<2x8x8x4xf32>
    %46 = vector.shape_cast %45 : vector<2x8x8x4xf32> to vector<128x4xf32>
    %c3_81 = arith.constant 3 : index
    %c0_82 = arith.constant 0 : index
    %c0_83 = arith.constant 0 : index
    %47 = vector.load %arg4[%c3_81, %c0_82, %c0_83] : memref<9x4x8xf32, #tpu.memory_space<vmem>>, vector<1x4x8xf32>
    %48 = vector.shape_cast %47 : vector<1x4x8xf32> to vector<4x8xf32>
    %cst_84 = arith.constant dense<0.000000e+00> : vector<128x8xf32>
    %49 = tpu.matmul %46, %48, %cst_84 {dimension_numbers = #tpu.dot_dimension_numbers<[1], [0], [0], [1], [0, 0, 1, 1], [], []>} : vector<128x4xf32>, vector<4x8xf32>, vector<128x8xf32> -> vector<128x8xf32>
    %50 = arith.addf %44, %49 : vector<128x8xf32>
    %c0_85 = arith.constant 0 : index
    %c1_86 = arith.constant 1 : index
    %c2_87 = arith.constant 2 : index
    %c0_88 = arith.constant 0 : index
    %51 = vector.load %arg9[%c0_85, %c1_86, %c2_87, %c0_88] : memref<2x10x12x4xf32, #tpu.memory_space<vmem>>, vector<2x8x8x4xf32>
    %52 = vector.shape_cast %51 : vector<2x8x8x4xf32> to vector<128x4xf32>
    %c4 = arith.constant 4 : index
    %c0_89 = arith.constant 0 : index
    %c0_90 = arith.constant 0 : index
    %53 = vector.load %arg4[%c4, %c0_89, %c0_90] : memref<9x4x8xf32, #tpu.memory_space<vmem>>, vector<1x4x8xf32>
    %54 = vector.shape_cast %53 : vector<1x4x8xf32> to vector<4x8xf32>
    %cst_91 = arith.constant dense<0.000000e+00> : vector<128x8xf32>
    %55 = tpu.matmul %52, %54, %cst_91 {dimension_numbers = #tpu.dot_dimension_numbers<[1], [0], [0], [1], [0, 0, 1, 1], [], []>} : vector<128x4xf32>, vector<4x8xf32>, vector<128x8xf32> -> vector<128x8xf32>
    %56 = arith.addf %50, %55 : vector<128x8xf32>
    %c0_92 = arith.constant 0 : index
    %c1_93 = arith.constant 1 : index
    %c3_94 = arith.constant 3 : index
    %c0_95 = arith.constant 0 : index
    %57 = vector.load %arg9[%c0_92, %c1_93, %c3_94, %c0_95] : memref<2x10x12x4xf32, #tpu.memory_space<vmem>>, vector<2x8x8x4xf32>
    %58 = vector.shape_cast %57 : vector<2x8x8x4xf32> to vector<128x4xf32>
    %c5 = arith.constant 5 : index
    %c0_96 = arith.constant 0 : index
    %c0_97 = arith.constant 0 : index
    %59 = vector.load %arg4[%c5, %c0_96, %c0_97] : memref<9x4x8xf32, #tpu.memory_space<vmem>>, vector<1x4x8xf32>
    %60 = vector.shape_cast %59 : vector<1x4x8xf32> to vector<4x8xf32>
    %cst_98 = arith.constant dense<0.000000e+00> : vector<128x8xf32>
    %61 = tpu.matmul %58, %60, %cst_98 {dimension_numbers = #tpu.dot_dimension_numbers<[1], [0], [0], [1], [0, 0, 1, 1], [], []>} : vector<128x4xf32>, vector<4x8xf32>, vector<128x8xf32> -> vector<128x8xf32>
    %62 = arith.addf %56, %61 : vector<128x8xf32>
    %c0_99 = arith.constant 0 : index
    %c2_100 = arith.constant 2 : index
    %c1_101 = arith.constant 1 : index
    %c0_102 = arith.constant 0 : index
    %63 = vector.load %arg9[%c0_99, %c2_100, %c1_101, %c0_102] : memref<2x10x12x4xf32, #tpu.memory_space<vmem>>, vector<2x8x8x4xf32>
    %64 = vector.shape_cast %63 : vector<2x8x8x4xf32> to vector<128x4xf32>
    %c6 = arith.constant 6 : index
    %c0_103 = arith.constant 0 : index
    %c0_104 = arith.constant 0 : index
    %65 = vector.load %arg4[%c6, %c0_103, %c0_104] : memref<9x4x8xf32, #tpu.memory_space<vmem>>, vector<1x4x8xf32>
    %66 = vector.shape_cast %65 : vector<1x4x8xf32> to vector<4x8xf32>
    %cst_105 = arith.constant dense<0.000000e+00> : vector<128x8xf32>
    %67 = tpu.matmul %64, %66, %cst_105 {dimension_numbers = #tpu.dot_dimension_numbers<[1], [0], [0], [1], [0, 0, 1, 1], [], []>} : vector<128x4xf32>, vector<4x8xf32>, vector<128x8xf32> -> vector<128x8xf32>
    %68 = arith.addf %62, %67 : vector<128x8xf32>
    %c0_106 = arith.constant 0 : index
    %c2_107 = arith.constant 2 : index
    %c2_108 = arith.constant 2 : index
    %c0_109 = arith.constant 0 : index
    %69 = vector.load %arg9[%c0_106, %c2_107, %c2_108, %c0_109] : memref<2x10x12x4xf32, #tpu.memory_space<vmem>>, vector<2x8x8x4xf32>
    %70 = vector.shape_cast %69 : vector<2x8x8x4xf32> to vector<128x4xf32>
    %c7 = arith.constant 7 : index
    %c0_110 = arith.constant 0 : index
    %c0_111 = arith.constant 0 : index
    %71 = vector.load %arg4[%c7, %c0_110, %c0_111] : memref<9x4x8xf32, #tpu.memory_space<vmem>>, vector<1x4x8xf32>
    %72 = vector.shape_cast %71 : vector<1x4x8xf32> to vector<4x8xf32>
    %cst_112 = arith.constant dense<0.000000e+00> : vector<128x8xf32>
    %73 = tpu.matmul %70, %72, %cst_112 {dimension_numbers = #tpu.dot_dimension_numbers<[1], [0], [0], [1], [0, 0, 1, 1], [], []>} : vector<128x4xf32>, vector<4x8xf32>, vector<128x8xf32> -> vector<128x8xf32>
    %74 = arith.addf %68, %73 : vector<128x8xf32>
    %c0_113 = arith.constant 0 : index
    %c2_114 = arith.constant 2 : index
    %c3_115 = arith.constant 3 : index
    %c0_116 = arith.constant 0 : index
    %75 = vector.load %arg9[%c0_113, %c2_114, %c3_115, %c0_116] : memref<2x10x12x4xf32, #tpu.memory_space<vmem>>, vector<2x8x8x4xf32>
    %76 = vector.shape_cast %75 : vector<2x8x8x4xf32> to vector<128x4xf32>
    %c8 = arith.constant 8 : index
    %c0_117 = arith.constant 0 : index
    %c0_118 = arith.constant 0 : index
    %77 = vector.load %arg4[%c8, %c0_117, %c0_118] : memref<9x4x8xf32, #tpu.memory_space<vmem>>, vector<1x4x8xf32>
    %78 = vector.shape_cast %77 : vector<1x4x8xf32> to vector<4x8xf32>
    %cst_119 = arith.constant dense<0.000000e+00> : vector<128x8xf32>
    %79 = tpu.matmul %76, %78, %cst_119 {dimension_numbers = #tpu.dot_dimension_numbers<[1], [0], [0], [1], [0, 0, 1, 1], [], []>} : vector<128x4xf32>, vector<4x8xf32>, vector<128x8xf32> -> vector<128x8xf32>
    %80 = arith.addf %74, %79 : vector<128x8xf32>
    %c0_120 = arith.constant 0 : index
    %c0_121 = arith.constant 0 : index
    %81 = vector.load %arg5[%c0_120, %c0_121] : memref<1x8xf32, #tpu.memory_space<vmem>>, vector<1x8xf32>
    %82 = vector.broadcast %81 : vector<1x8xf32> to vector<128x8xf32>
    %83 = arith.addf %80, %82 : vector<128x8xf32>
    %cst_122 = arith.constant 0.000000e+00 : f32
    %84 = vector.broadcast %cst_122 : f32 to vector<128x8xf32>
    %85 = arith.maximumf %83, %84 : vector<128x8xf32>
    %86 = vector.shape_cast %85 : vector<128x8xf32> to vector<2x8x8x8xf32>
    %c0_123 = arith.constant 0 : index
    %c1_124 = arith.constant 1 : index
    %c2_125 = arith.constant 2 : index
    %c0_126 = arith.constant 0 : index
    %87 = vector.load %arg10[%c0_123, %c1_124, %c2_125, %c0_126] : memref<2x10x12x8xf32, #tpu.memory_space<vmem>>, vector<2x8x8x8xf32>
    tpu.vector_store %arg10[%c0_123, %c1_124, %c2_125, %c0_126], %86 {strides = array<i32>} : memref<2x10x12x8xf32, #tpu.memory_space<vmem>>, vector<2x8x8x8xf32>,
    %c0_127 = arith.constant 0 : index
    %c0_128 = arith.constant 0 : index
    %c1_129 = arith.constant 1 : index
    %c0_130 = arith.constant 0 : index
    %88 = vector.load %arg10[%c0_127, %c0_128, %c1_129, %c0_130] : memref<2x10x12x8xf32, #tpu.memory_space<vmem>>, vector<2x8x8x8xf32>
    %89 = vector.shape_cast %88 : vector<2x8x8x8xf32> to vector<128x8xf32>
    %c0_131 = arith.constant 0 : index
    %c0_132 = arith.constant 0 : index
    %c0_133 = arith.constant 0 : index
    %90 = vector.load %arg6[%c0_131, %c0_132, %c0_133] : memref<9x8x128xf32, #tpu.memory_space<vmem>>, vector<1x8x128xf32>
    %91 = vector.shape_cast %90 : vector<1x8x128xf32> to vector<8x128xf32>
    %cst_134 = arith.constant dense<0.000000e+00> : vector<128x128xf32>
    %92 = tpu.matmul %89, %91, %cst_134 {dimension_numbers = #tpu.dot_dimension_numbers<[1], [0], [0], [1], [0, 0, 1, 1], [], []>} : vector<128x8xf32>, vector<8x128xf32>, vector<128x128xf32> -> vector<128x128xf32>
    %c0_135 = arith.constant 0 : index
    %c0_136 = arith.constant 0 : index
    %c2_137 = arith.constant 2 : index
    %c0_138 = arith.constant 0 : index
    %93 = vector.load %arg10[%c0_135, %c0_136, %c2_137, %c0_138] : memref<2x10x12x8xf32, #tpu.memory_space<vmem>>, vector<2x8x8x8xf32>
    %94 = vector.shape_cast %93 : vector<2x8x8x8xf32> to vector<128x8xf32>
    %c1_139 = arith.constant 1 : index
    %c0_140 = arith.constant 0 : index
    %c0_141 = arith.constant 0 : index
    %95 = vector.load %arg6[%c1_139, %c0_140, %c0_141] : memref<9x8x128xf32, #tpu.memory_space<vmem>>, vector<1x8x128xf32>
    %96 = vector.shape_cast %95 : vector<1x8x128xf32> to vector<8x128xf32>
    %cst_142 = arith.constant dense<0.000000e+00> : vector<128x128xf32>
    %97 = tpu.matmul %94, %96, %cst_142 {dimension_numbers = #tpu.dot_dimension_numbers<[1], [0], [0], [1], [0, 0, 1, 1], [], []>} : vector<128x8xf32>, vector<8x128xf32>, vector<128x128xf32> -> vector<128x128xf32>
    %98 = arith.addf %92, %97 : vector<128x128xf32>
    %c0_143 = arith.constant 0 : index
    %c0_144 = arith.constant 0 : index
    %c3_145 = arith.constant 3 : index
    %c0_146 = arith.constant 0 : index
    %99 = vector.load %arg10[%c0_143, %c0_144, %c3_145, %c0_146] : memref<2x10x12x8xf32, #tpu.memory_space<vmem>>, vector<2x8x8x8xf32>
    %100 = vector.shape_cast %99 : vector<2x8x8x8xf32> to vector<128x8xf32>
    %c2_147 = arith.constant 2 : index
    %c0_148 = arith.constant 0 : index
    %c0_149 = arith.constant 0 : index
    %101 = vector.load %arg6[%c2_147, %c0_148, %c0_149] : memref<9x8x128xf32, #tpu.memory_space<vmem>>, vector<1x8x128xf32>
    %102 = vector.shape_cast %101 : vector<1x8x128xf32> to vector<8x128xf32>
    %cst_150 = arith.constant dense<0.000000e+00> : vector<128x128xf32>
    %103 = tpu.matmul %100, %102, %cst_150 {dimension_numbers = #tpu.dot_dimension_numbers<[1], [0], [0], [1], [0, 0, 1, 1], [], []>} : vector<128x8xf32>, vector<8x128xf32>, vector<128x128xf32> -> vector<128x128xf32>
    %104 = arith.addf %98, %103 : vector<128x128xf32>
    %c0_151 = arith.constant 0 : index
    %c1_152 = arith.constant 1 : index
    %c1_153 = arith.constant 1 : index
    %c0_154 = arith.constant 0 : index
    %105 = vector.load %arg10[%c0_151, %c1_152, %c1_153, %c0_154] : memref<2x10x12x8xf32, #tpu.memory_space<vmem>>, vector<2x8x8x8xf32>
    %106 = vector.shape_cast %105 : vector<2x8x8x8xf32> to vector<128x8xf32>
    %c3_155 = arith.constant 3 : index
    %c0_156 = arith.constant 0 : index
    %c0_157 = arith.constant 0 : index
    %107 = vector.load %arg6[%c3_155, %c0_156, %c0_157] : memref<9x8x128xf32, #tpu.memory_space<vmem>>, vector<1x8x128xf32>
    %108 = vector.shape_cast %107 : vector<1x8x128xf32> to vector<8x128xf32>
    %cst_158 = arith.constant dense<0.000000e+00> : vector<128x128xf32>
    %109 = tpu.matmul %106, %108, %cst_158 {dimension_numbers = #tpu.dot_dimension_numbers<[1], [0], [0], [1], [0, 0, 1, 1], [], []>} : vector<128x8xf32>, vector<8x128xf32>, vector<128x128xf32> -> vector<128x128xf32>
    %110 = arith.addf %104, %109 : vector<128x128xf32>
    %c0_159 = arith.constant 0 : index
    %c1_160 = arith.constant 1 : index
    %c2_161 = arith.constant 2 : index
    %c0_162 = arith.constant 0 : index
    %111 = vector.load %arg10[%c0_159, %c1_160, %c2_161, %c0_162] : memref<2x10x12x8xf32, #tpu.memory_space<vmem>>, vector<2x8x8x8xf32>
    %112 = vector.shape_cast %111 : vector<2x8x8x8xf32> to vector<128x8xf32>
    %c4_163 = arith.constant 4 : index
    %c0_164 = arith.constant 0 : index
    %c0_165 = arith.constant 0 : index
    %113 = vector.load %arg6[%c4_163, %c0_164, %c0_165] : memref<9x8x128xf32, #tpu.memory_space<vmem>>, vector<1x8x128xf32>
    %114 = vector.shape_cast %113 : vector<1x8x128xf32> to vector<8x128xf32>
    %cst_166 = arith.constant dense<0.000000e+00> : vector<128x128xf32>
    %115 = tpu.matmul %112, %114, %cst_166 {dimension_numbers = #tpu.dot_dimension_numbers<[1], [0], [0], [1], [0, 0, 1, 1], [], []>} : vector<128x8xf32>, vector<8x128xf32>, vector<128x128xf32> -> vector<128x128xf32>
    %116 = arith.addf %110, %115 : vector<128x128xf32>
    %c0_167 = arith.constant 0 : index
    %c1_168 = arith.constant 1 : index
    %c3_169 = arith.constant 3 : index
    %c0_170 = arith.constant 0 : index
    %117 = vector.load %arg10[%c0_167, %c1_168, %c3_169, %c0_170] : memref<2x10x12x8xf32, #tpu.memory_space<vmem>>, vector<2x8x8x8xf32>
    %118 = vector.shape_cast %117 : vector<2x8x8x8xf32> to vector<128x8xf32>
    %c5_171 = arith.constant 5 : index
    %c0_172 = arith.constant 0 : index
    %c0_173 = arith.constant 0 : index
    %119 = vector.load %arg6[%c5_171, %c0_172, %c0_173] : memref<9x8x128xf32, #tpu.memory_space<vmem>>, vector<1x8x128xf32>
    %120 = vector.shape_cast %119 : vector<1x8x128xf32> to vector<8x128xf32>
    %cst_174 = arith.constant dense<0.000000e+00> : vector<128x128xf32>
    %121 = tpu.matmul %118, %120, %cst_174 {dimension_numbers = #tpu.dot_dimension_numbers<[1], [0], [0], [1], [0, 0, 1, 1], [], []>} : vector<128x8xf32>, vector<8x128xf32>, vector<128x128xf32> -> vector<128x128xf32>
    %122 = arith.addf %116, %121 : vector<128x128xf32>
    %c0_175 = arith.constant 0 : index
    %c2_176 = arith.constant 2 : index
    %c1_177 = arith.constant 1 : index
    %c0_178 = arith.constant 0 : index
    %123 = vector.load %arg10[%c0_175, %c2_176, %c1_177, %c0_178] : memref<2x10x12x8xf32, #tpu.memory_space<vmem>>, vector<2x8x8x8xf32>
    %124 = vector.shape_cast %123 : vector<2x8x8x8xf32> to vector<128x8xf32>
    %c6_179 = arith.constant 6 : index
    %c0_180 = arith.constant 0 : index
    %c0_181 = arith.constant 0 : index
    %125 = vector.load %arg6[%c6_179, %c0_180, %c0_181] : memref<9x8x128xf32, #tpu.memory_space<vmem>>, vector<1x8x128xf32>
    %126 = vector.shape_cast %125 : vector<1x8x128xf32> to vector<8x128xf32>
    %cst_182 = arith.constant dense<0.000000e+00> : vector<128x128xf32>
    %127 = tpu.matmul %124, %126, %cst_182 {dimension_numbers = #tpu.dot_dimension_numbers<[1], [0], [0], [1], [0, 0, 1, 1], [], []>} : vector<128x8xf32>, vector<8x128xf32>, vector<128x128xf32> -> vector<128x128xf32>
    %128 = arith.addf %122, %127 : vector<128x128xf32>
    %c0_183 = arith.constant 0 : index
    %c2_184 = arith.constant 2 : index
    %c2_185 = arith.constant 2 : index
    %c0_186 = arith.constant 0 : index
    %129 = vector.load %arg10[%c0_183, %c2_184, %c2_185, %c0_186] : memref<2x10x12x8xf32, #tpu.memory_space<vmem>>, vector<2x8x8x8xf32>
    %130 = vector.shape_cast %129 : vector<2x8x8x8xf32> to vector<128x8xf32>
    %c7_187 = arith.constant 7 : index
    %c0_188 = arith.constant 0 : index
    %c0_189 = arith.constant 0 : index
    %131 = vector.load %arg6[%c7_187, %c0_188, %c0_189] : memref<9x8x128xf32, #tpu.memory_space<vmem>>, vector<1x8x128xf32>
    %132 = vector.shape_cast %131 : vector<1x8x128xf32> to vector<8x128xf32>
    %cst_190 = arith.constant dense<0.000000e+00> : vector<128x128xf32>
    %133 = tpu.matmul %130, %132, %cst_190 {dimension_numbers = #tpu.dot_dimension_numbers<[1], [0], [0], [1], [0, 0, 1, 1], [], []>} : vector<128x8xf32>, vector<8x128xf32>, vector<128x128xf32> -> vector<128x128xf32>
    %134 = arith.addf %128, %133 : vector<128x128xf32>
    %c0_191 = arith.constant 0 : index
    %c2_192 = arith.constant 2 : index
    %c3_193 = arith.constant 3 : index
    %c0_194 = arith.constant 0 : index
    %135 = vector.load %arg10[%c0_191, %c2_192, %c3_193, %c0_194] : memref<2x10x12x8xf32, #tpu.memory_space<vmem>>, vector<2x8x8x8xf32>
    %136 = vector.shape_cast %135 : vector<2x8x8x8xf32> to vector<128x8xf32>
    %c8_195 = arith.constant 8 : index
    %c0_196 = arith.constant 0 : index
    %c0_197 = arith.constant 0 : index
    %137 = vector.load %arg6[%c8_195, %c0_196, %c0_197] : memref<9x8x128xf32, #tpu.memory_space<vmem>>, vector<1x8x128xf32>
    %138 = vector.shape_cast %137 : vector<1x8x128xf32> to vector<8x128xf32>
    %cst_198 = arith.constant dense<0.000000e+00> : vector<128x128xf32>
    %139 = tpu.matmul %136, %138, %cst_198 {dimension_numbers = #tpu.dot_dimension_numbers<[1], [0], [0], [1], [0, 0, 1, 1], [], []>} : vector<128x8xf32>, vector<8x128xf32>, vector<128x128xf32> -> vector<128x128xf32>
    %140 = arith.addf %134, %139 : vector<128x128xf32>
    %c0_199 = arith.constant 0 : index
    %c0_200 = arith.constant 0 : index
    %141 = vector.load %arg7[%c0_199, %c0_200] : memref<1x128xf32, #tpu.memory_space<vmem>>, vector<1x128xf32>
    %142 = vector.broadcast %141 : vector<1x128xf32> to vector<128x128xf32>
    %143 = arith.addf %140, %142 : vector<128x128xf32>
    %cst_201 = arith.constant 0.000000e+00 : f32
    %144 = vector.broadcast %cst_201 : f32 to vector<128x128xf32>
    %145 = arith.maximumf %143, %144 : vector<128x128xf32>
    %146 = vector.shape_cast %145 : vector<128x128xf32> to vector<2x64x128xf32>
    %c0_202 = arith.constant 0 : index
    %c0_203 = arith.constant 0 : index
    %c0_204 = arith.constant 0 : index
    %147 = vector.load %arg8[%c0_202, %c0_203, %c0_204] : memref<2x64x128xf32, #tpu.memory_space<vmem>>, vector<2x64x128xf32>
    tpu.vector_store %arg8[%c0_202, %c0_203, %c0_204], %146 {strides = array<i32>} : memref<2x64x128xf32, #tpu.memory_space<vmem>>, vector<2x64x128xf32>,
    return
  }
  func.func @transform_0(%arg0: i32) -> (i32, i32, i32, i32, i32) {
    %c0_i32 = arith.constant 0 : i32
    %c0_i32_0 = arith.constant 0 : i32
    %c0_i32_1 = arith.constant 0 : i32
    %c0_i32_2 = arith.constant 0 : i32
    %c0_i32_3 = arith.constant 0 : i32
    return %arg0, %c0_i32, %c0_i32_0, %c0_i32_1, %c0_i32_2 : i32, i32, i32, i32, i32
  }
  func.func @transform_1(%arg0: i32) -> (i32, i32, i32) {
    %c0_i32 = arith.constant 0 : i32
    %c0_i32_0 = arith.constant 0 : i32
    %c0_i32_1 = arith.constant 0 : i32
    %c0_i32_2 = arith.constant 0 : i32
    return %c0_i32, %c0_i32_0, %c0_i32_1 : i32, i32, i32
  }
  func.func @transform_2(%arg0: i32) -> (i32, i32) {
    %c0_i32 = arith.constant 0 : i32
    %c0_i32_0 = arith.constant 0 : i32
    %c0_i32_1 = arith.constant 0 : i32
    return %c0_i32, %c0_i32_0 : i32, i32
  }
  func.func @transform_3(%arg0: i32) -> (i32, i32, i32) {
    %c0_i32 = arith.constant 0 : i32
    %c0_i32_0 = arith.constant 0 : i32
    %c0_i32_1 = arith.constant 0 : i32
    %c0_i32_2 = arith.constant 0 : i32
    return %c0_i32, %c0_i32_0, %c0_i32_1 : i32, i32, i32
  }
  func.func @transform_4(%arg0: i32) -> (i32, i32) {
    %c0_i32 = arith.constant 0 : i32
    %c0_i32_0 = arith.constant 0 : i32
    %c0_i32_1 = arith.constant 0 : i32
    return %c0_i32, %c0_i32_0 : i32, i32
  }
  func.func @transform_5(%arg0: i32) -> (i32, i32, i32) {
    %c0_i32 = arith.constant 0 : i32
    %c0_i32_0 = arith.constant 0 : i32
    %c0_i32_1 = arith.constant 0 : i32
    %c0_i32_2 = arith.constant 0 : i32
    return %c0_i32, %c0_i32_0, %c0_i32_1 : i32, i32, i32
  }
  func.func @transform_6(%arg0: i32) -> (i32, i32) {
    %c0_i32 = arith.constant 0 : i32
    %c0_i32_0 = arith.constant 0 : i32
    %c0_i32_1 = arith.constant 0 : i32
    return %c0_i32, %c0_i32_0 : i32, i32
  }
  func.func @transform_7(%arg0: i32) -> (i32, i32, i32) {
    %c0_i32 = arith.constant 0 : i32
    %c0_i32_0 = arith.constant 0 : i32
    %c0_i32_1 = arith.constant 0 : i32
    return %arg0, %c0_i32, %c0_i32_0 : i32, i32, i32
  }
}

</mosaic_0001>

<bundles_post_ra>
// kernel: tpu_custom_call.1
= control target key start
LH: loop header
LB: loop body
LE: loop exit
PB: predicated region body
PF: predicated region fallthrough
CT: control target
= control target key end

     0   :  { %12 = vsyncpa [#allocation5], 0  ;;  %s5018_s0 = inlined_call_operand.hbm [shape: f32[2,8,2,8,8], index: 0, kind: input, shape index: {}]   ;;  %s5019_s1 = inlined_call_operand.vmem [shape: f32[2,8,4], index: 1, kind: input, shape index: {}]   ;;  %s5020_s2 = inlined_call_operand.vmem [shape: f32[1,4], index: 2, kind: input, shape index: {}]   ;;  %s5021_s3 = inlined_call_operand.vmem [shape: f32[9,4,8], index: 3, kind: input, shape index: {}]   ;;  %s5022_s4 = inlined_call_operand.vmem [shape: f32[1,8], index: 4, kind: input, shape index: {}]   ;;  %s5023_s5 = inlined_call_operand.vmem [shape: f32[9,8,128], index: 5, kind: input, shape index: {}]   ;;  %s5024_s6 = inlined_call_operand.vmem [shape: f32[1,128], index: 6, kind: input, shape index: {}]   ;;  %s5025_s7 = inlined_call_operand.hbm [shape: f32[2,64,128], index: 7, kind: output, shape index: {}]  }
   0x1   :  { %13 = vsyncpa [#allocation6], 0  ;;  %s18_s26 = sshll.u32 %s5018_s0, 4  ;;  %s3586_s27 = smov [#allocation4]   ;;  %s19_s26 = int_to_ptr.hbm [resolvable:$true] %s18_s26 }
   0x2   :  { %s20_s28 = sshll.u32 %s3586_s27, 4  ;;  %s3587_s29 = smov 128   ;;  %s21_s28 = int_to_ptr.vmem [resolvable:$true] %s20_s28 }
   0x3   :  { %s3588_s30 = smov 8  }
   0x4   :  { %26 = dma.hbm_to_vmem [thread:$0]  %s19_s26, 4096, %s21_s28, [#allocation5], %s3587_s29, %s3587_s29, %s3588_s30  }
   0x5   :  { %3582 = dma.done.wait [#allocation5], 4096  }
   0x6   :  { %3583 = vsyncadd [#allocation5], 4294963200  ;;  %vm95_vm0 = vcmask 64512   ;;  %v3180_v0 = vld [vmem:[%s5019_s1 + $0x8] sm:$0xff]  ;;  %v163_v1 = vld [vmem:[%s5019_s1] sm:$0xff]  ;;  %vm43_vm1 = vcmask 31744  }
   0x7   :  { %v165_v2 = vld [vmem:[#allocation4 + $0x8] sm:$0xff]  ;;  %246 = vmatpush.msra.mxu0 %v3180_v0  ;;  %359 = vmatpush.msra.mxu1 %v163_v1  ;;  %v147_v3 = vld [vmem:[#allocation4] sm:$0xff]  ;;  %v166_v4 = vld [vmem:[#allocation4 + $0x18] sm:$0xff]  ;;  %v3589_v26 = vmov 0.0   ;;  %vm45_vm2 = vcmask 27648   ;;  %vm529_vm3 = vcmask 1043456  }
   0x8   :  { %3181 = vmatmul.msk.f32.vlgmr.msra.gmra.mxu0 %vm95_vm0, %v165_v2  ;;  %3197 = vmatmul.msk.f32.vlgmr.msra.gmra.mxu1 %vm95_vm0, %v147_v3  ;;  %v148_v5 = vld [vmem:[#allocation4 + $0x10] sm:$0xff]  ;;  %v167_v6 = vld [vmem:[#allocation4 + $0x28] sm:$0xff]  ;;  %v149_v7 = vld [vmem:[#allocation4 + $0x20] sm:$0xff]  ;;  %44 = vst.msk [vmem:[#allocation2] sm:$0xff] %vm43_vm1, %v3589_v26  ;;  %vm54_vm4 = vcmask 24576   ;;  %vm97_vm5 = vcmask 60416  }
   0x9   :  { %v168_v8 = vld [vmem:[#allocation4 + $0x38] sm:$0xff]  ;;  %v150_v9 = vld [vmem:[#allocation4 + $0x30] sm:$0xff]  ;;  %v169_v10 = vld [vmem:[#allocation4 + $0x48] sm:$0xff]  ;;  %46 = vst.msk [vmem:[#allocation2 + $0x8] sm:$0xf] %vm45_vm2, %v3589_v26  ;;  %vm106_vm6 = vcmask 57344  }
   0xa   :  { %v151_v11 = vld [vmem:[#allocation4 + $0x40] sm:$0xff]  ;;  %v170_v12 = vld [vmem:[#allocation4 + $0x58] sm:$0xff]  ;;  %v152_v13 = vld [vmem:[#allocation4 + $0x50] sm:$0xff]  ;;  %47 = vst.msk [vmem:[#allocation2 + $0xa0] sm:$0xff] %vm43_vm1, %v3589_v26  ;;  %s3167_s27 = sshll.u32 %s5025_s7, 4  ;;  %s3168_s27 = int_to_ptr.hbm [resolvable:$true] %s3167_s27 }
   0xb   :  { %v171_v14 = vld [vmem:[#allocation4 + $0x68] sm:$0xff]  ;;  %v153_v15 = vld [vmem:[#allocation4 + $0x60] sm:$0xff]  ;;  %v172_v16 = vld [vmem:[#allocation4 + $0x78] sm:$0xff]  ;;  %48 = vst.msk [vmem:[#allocation2 + $0xa8] sm:$0xf] %vm45_vm2, %v3589_v26 }
   0xc   :  { %v154_v17 = vld [vmem:[#allocation4 + $0x70] sm:$0xff]  ;;  %v173_v18 = vld [vmem:[#allocation4 + $0x88] sm:$0xff]  ;;  %v155_v19 = vld [vmem:[#allocation4 + $0x80] sm:$0xff]  ;;  %50 = vst.msk [vmem:[#allocation2 + $0x90] sm:$0xff] %vm43_vm1, %v3589_v26 }
   0xd   :  { %v174_v20 = vld [vmem:[#allocation4 + $0x98] sm:$0xff]  ;;  %v156_v21 = vld [vmem:[#allocation4 + $0x90] sm:$0xff]  ;;  %v175_v22 = vld [vmem:[#allocation4 + $0xa8] sm:$0xff]  ;;  %51 = vst.msk [vmem:[#allocation2 + $0x98] sm:$0xf] %vm45_vm2, %v3589_v26 }
   0xe   :  { %v157_v23 = vld [vmem:[#allocation4 + $0xa0] sm:$0xff]  ;;  %v176_v24 = vld [vmem:[#allocation4 + $0xb8] sm:$0xff]  ;;  %v158_v25 = vld [vmem:[#allocation4 + $0xb0] sm:$0xff]  ;;  %52 = vst.msk [vmem:[#allocation2 + $0x130] sm:$0xff] %vm43_vm1, %v3589_v26 }
   0xf   :  { %v177_v27 = vld [vmem:[#allocation4 + $0xc8] sm:$0xff]  ;;  %v159_v28 = vld [vmem:[#allocation4 + $0xc0] sm:$0xff]  ;;  %96 = vst.msk [vmem:[#allocation3] sm:$0xff] %vm95_vm0, %v3589_v26  ;;  %v178_v33 = vld [vmem:[#allocation4 + $0xd8] sm:$0xff] }
  0x10   :  { %3182 = vmatmul.msk.f32.gmra.mxu0 %vm95_vm0, %v166_v4  ;;  %3198 = vmatmul.msk.f32.gmra.mxu1 %vm95_vm0, %v148_v5  ;;  %v3213_v29 = vld [vmem:[%s5021_s3 + $0x4] sm:$0xf]  ;;  %v462_v30 = vld [vmem:[%s5021_s3] sm:$0xf]  ;;  %53 = vst.msk [vmem:[#allocation2 + $0x138] sm:$0xf] %vm45_vm2, %v3589_v26 }
  0x11   :  { %3214 = vmatpush.msk.msra.mxu2 %vm529_vm3, %v3213_v29  ;;  %v463_v31 = vld [vmem:[#allocation2 + $0x2] sm:$0xff]  ;;  %99 = vst.msk [vmem:[#allocation3 + $0xa0] sm:$0xff] %vm95_vm0, %v3589_v26  ;;  %3231 = vmatpush.msk.msra.mxu3 %vm529_vm3, %v462_v30  ;;  %v160_v34 = vld [vmem:[#allocation4 + $0xd0] sm:$0xff]  ;;  %v3266_v36 = vld [vmem:[%s5021_s3 + $0xc] sm:$0xf] }
  0x12   :  { %v3248_v32 = vld [vmem:[%s5021_s3 + $0x8] sm:$0xf]  ;;  %3215 = vmatmul.msk.f32.vlgmr.msra.gmra.mxu2 %vm43_vm1, %v463_v31  ;;  %102 = vst.msk [vmem:[#allocation3 + $0x90] sm:$0xff] %vm95_vm0, %v3589_v26  ;;  %v3284_v37 = vld [vmem:[%s5021_s3 + $0x10] sm:$0xf]  ;;  %3267 = vmatpush.msk.msrb.mxu1 %vm529_vm3, %v3266_v36  ;;  %v161_v39 = vld [vmem:[#allocation4 + $0xe0] sm:$0xff] }
  0x13   :  { %104 = vst.msk [vmem:[#allocation3 + $0x130] sm:$0xff] %vm95_vm0, %v3589_v26  ;;  %3249 = vmatpush.msk.msrb.mxu0 %vm529_vm3, %v3248_v32  ;;  %3285 = vmatpush.msk.msrb.mxu2 %vm529_vm3, %v3284_v37  ;;  %v179_v38 = vld [vmem:[#allocation4 + $0xe8] sm:$0xff]  ;;  %v180_v40 = vld [vmem:[#allocation4 + $0xf8] sm:$0xff]  ;;  %v162_v41 = vld [vmem:[#allocation4 + $0xf0] sm:$0xff] }
  0x14   :  { %55 = vst.msk [vmem:[#allocation2 + $0x1] sm:$0x1] %vm54_vm4, %v3589_v26  ;;  %v3774_v42 = vld [vmem:[%s5020_s2] ss:$0 sm:$0xff] }
  0x15   :  { %56 = vst.msk [vmem:[#allocation2 + $0x11] sm:$0x1] %vm54_vm4, %v3589_v26 }
  0x16   :  { %57 = vst.msk [vmem:[#allocation2 + $0x21] sm:$0x1] %vm54_vm4, %v3589_v26 }
  0x17   :  { %58 = vst.msk [vmem:[#allocation2 + $0x31] sm:$0x1] %vm54_vm4, %v3589_v26 }
  0x18   :  { %3183 = vmatmul.msk.f32.gmra.mxu0 %vm95_vm0, %v167_v6  ;;  %3199 = vmatmul.msk.f32.gmra.mxu1 %vm95_vm0, %v149_v7  ;;  %59 = vst.msk [vmem:[#allocation2 + $0x41] sm:$0x1] %vm54_vm4, %v3589_v26 }
  0x19   :  { %60 = vst.msk [vmem:[#allocation2 + $0x51] sm:$0x1] %vm54_vm4, %v3589_v26 }
  0x1a   :  { %61 = vst.msk [vmem:[#allocation2 + $0x61] sm:$0x1] %vm54_vm4, %v3589_v26 }
  0x1b   :  { %v446_v35 = vld [vmem:[#allocation2 + $0x1] sm:$0xff]  ;;  %62 = vst.msk [vmem:[#allocation2 + $0x71] sm:$0x1] %vm54_vm4, %v3589_v26 }
  0x1c   :  { %3232 = vmatmul.msk.f32.vlgmr.msra.gmra.mxu3 %vm43_vm1, %v446_v35  ;;  %63 = vst.msk [vmem:[#allocation2 + $0x81] sm:$0x1] %vm54_vm4, %v3589_v26 }
  0x1d   :  { %64 = vst.msk [vmem:[#allocation2 + $0x91] sm:$0x1] %vm54_vm4, %v3589_v26 }
  0x1e   :  { %65 = vst.msk [vmem:[#allocation2 + $0xa1] sm:$0x1] %vm54_vm4, %v3589_v26 }
  0x1f   :  { %66 = vst.msk [vmem:[#allocation2 + $0xb1] sm:$0x1] %vm54_vm4, %v3589_v26 }
  0x20   :  { %3184 = vmatmul.msk.f32.gmra.mxu0 %vm95_vm0, %v168_v8  ;;  %3200 = vmatmul.msk.f32.gmra.mxu1 %vm95_vm0, %v150_v9  ;;  %67 = vst.msk [vmem:[#allocation2 + $0xc1] sm:$0x1] %vm54_vm4, %v3589_v26 }
  0x21   :  { %68 = vst.msk [vmem:[#allocation2 + $0xd1] sm:$0x1] %vm54_vm4, %v3589_v26 }
  0x22   :  { %69 = vst.msk [vmem:[#allocation2 + $0xe1] sm:$0x1] %vm54_vm4, %v3589_v26 }
  0x23   :  { %70 = vst.msk [vmem:[#allocation2 + $0xf1] sm:$0x1] %vm54_vm4, %v3589_v26 }
  0x24   :  { %71 = vst.msk [vmem:[#allocation2 + $0x101] sm:$0x1] %vm54_vm4, %v3589_v26 }
  0x25   :  { %72 = vst.msk [vmem:[#allocation2 + $0x111] sm:$0x1] %vm54_vm4, %v3589_v26 }
  0x26   :  { %73 = vst.msk [vmem:[#allocation2 + $0x121] sm:$0x1] %vm54_vm4, %v3589_v26 }
  0x27   :  { %74 = vst.msk [vmem:[#allocation2 + $0x131] sm:$0x1] %vm54_vm4, %v3589_v26 }
  0x28   :  { %3185 = vmatmul.msk.f32.gmra.mxu0 %vm95_vm0, %v169_v10  ;;  %3201 = vmatmul.msk.f32.gmra.mxu1 %vm95_vm0, %v151_v11  ;;  %75 = vst.msk [vmem:[#allocation2 + $0xa] sm:$0x1] %vm54_vm4, %v3589_v26 }
  0x29   :  { %76 = vst.msk [vmem:[#allocation2 + $0x1a] sm:$0x1] %vm54_vm4, %v3589_v26 }
  0x2a   :  { %77 = vst.msk [vmem:[#allocation2 + $0x2a] sm:$0x1] %vm54_vm4, %v3589_v26 }
  0x2b   :  { %78 = vst.msk [vmem:[#allocation2 + $0x3a] sm:$0x1] %vm54_vm4, %v3589_v26 }
  0x2c   :  { %79 = vst.msk [vmem:[#allocation2 + $0x4a] sm:$0x1] %vm54_vm4, %v3589_v26 }
  0x2d   :  { %80 = vst.msk [vmem:[#allocation2 + $0x5a] sm:$0x1] %vm54_vm4, %v3589_v26 }
  0x2e   :  { %81 = vst.msk [vmem:[#allocation2 + $0x6a] sm:$0x1] %vm54_vm4, %v3589_v26 }
  0x2f   :  { %82 = vst.msk [vmem:[#allocation2 + $0x7a] sm:$0x1] %vm54_vm4, %v3589_v26  ;;  %v714_v46 = vld [vmem:[#allocation2 + $0x3] sm:$0xff] }
  0x30   :  { %3186 = vmatmul.msk.f32.gmra.mxu0 %vm95_vm0, %v170_v12  ;;  %3202 = vmatmul.msk.f32.gmra.mxu1 %vm95_vm0, %v152_v13  ;;  %83 = vst.msk [vmem:[#allocation2 + $0x8a] sm:$0x1] %vm54_vm4, %v3589_v26 }
  0x31   :  { %84 = vst.msk [vmem:[#allocation2 + $0x9a] sm:$0x1] %vm54_vm4, %v3589_v26 }
  0x32   :  { %85 = vst.msk [vmem:[#allocation2 + $0xaa] sm:$0x1] %vm54_vm4, %v3589_v26 }
  0x33   :  { %86 = vst.msk [vmem:[#allocation2 + $0xba] sm:$0x1] %vm54_vm4, %v3589_v26 }
  0x34   :  { %87 = vst.msk [vmem:[#allocation2 + $0xca] sm:$0x1] %vm54_vm4, %v3589_v26 }
  0x35   :  { %88 = vst.msk [vmem:[#allocation2 + $0xda] sm:$0x1] %vm54_vm4, %v3589_v26 }
  0x36   :  { %89 = vst.msk [vmem:[#allocation2 + $0xea] sm:$0x1] %vm54_vm4, %v3589_v26 }
  0x37   :  { %90 = vst.msk [vmem:[#allocation2 + $0xfa] sm:$0x1] %vm54_vm4, %v3589_v26 }
  0x38   :  { %3187 = vmatmul.msk.f32.gmra.mxu0 %vm95_vm0, %v171_v14  ;;  %3203 = vmatmul.msk.f32.gmra.mxu1 %vm95_vm0, %v153_v15  ;;  %91 = vst.msk [vmem:[#allocation2 + $0x10a] sm:$0x1] %vm54_vm4, %v3589_v26 }
  0x39   :  { %92 = vst.msk [vmem:[#allocation2 + $0x11a] sm:$0x1] %vm54_vm4, %v3589_v26 }
  0x3a   :  { %93 = vst.msk [vmem:[#allocation2 + $0x12a] sm:$0x1] %vm54_vm4, %v3589_v26 }
  0x3b   :  { %94 = vst.msk [vmem:[#allocation2 + $0x13a] sm:$0x1] %vm54_vm4, %v3589_v26 }
  0x3c   :  { %98 = vst.msk [vmem:[#allocation3 + $0x8] sm:$0xf] %vm97_vm5, %v3589_v26 }
  0x3d   :  { %100 = vst.msk [vmem:[#allocation3 + $0xa8] sm:$0xf] %vm97_vm5, %v3589_v26 }
  0x3e   :  { %103 = vst.msk [vmem:[#allocation3 + $0x98] sm:$0xf] %vm97_vm5, %v3589_v26 }
  0x3f   :  { %105 = vst.msk [vmem:[#allocation3 + $0x138] sm:$0xf] %vm97_vm5, %v3589_v26 }
  0x40   :  { %3188 = vmatmul.msk.f32.gmra.mxu0 %vm95_vm0, %v172_v16  ;;  %3204 = vmatmul.msk.f32.gmra.mxu1 %vm95_vm0, %v154_v17  ;;  %107 = vst.msk [vmem:[#allocation3 + $0x1] sm:$0x1] %vm106_vm6, %v3589_v26 }
  0x41   :  { %108 = vst.msk [vmem:[#allocation3 + $0x11] sm:$0x1] %vm106_vm6, %v3589_v26 }
  0x42   :  { %109 = vst.msk [vmem:[#allocation3 + $0x21] sm:$0x1] %vm106_vm6, %v3589_v26 }
  0x43   :  { %110 = vst.msk [vmem:[#allocation3 + $0x31] sm:$0x1] %vm106_vm6, %v3589_v26 }
  0x44   :  { %111 = vst.msk [vmem:[#allocation3 + $0x41] sm:$0x1] %vm106_vm6, %v3589_v26 }
  0x45   :  { %112 = vst.msk [vmem:[#allocation3 + $0x51] sm:$0x1] %vm106_vm6, %v3589_v26 }
  0x46   :  { %113 = vst.msk [vmem:[#allocation3 + $0x61] sm:$0x1] %vm106_vm6, %v3589_v26 }
  0x47   :  { %114 = vst.msk [vmem:[#allocation3 + $0x71] sm:$0x1] %vm106_vm6, %v3589_v26 }
  0x48   :  { %3189 = vmatmul.msk.f32.gmra.mxu0 %vm95_vm0, %v173_v18  ;;  %3205 = vmatmul.msk.f32.gmra.mxu1 %vm95_vm0, %v155_v19  ;;  %115 = vst.msk [vmem:[#allocation3 + $0x81] sm:$0x1] %vm106_vm6, %v3589_v26 }
  0x49   :  { %116 = vst.msk [vmem:[#allocation3 + $0x91] sm:$0x1] %vm106_vm6, %v3589_v26 }
  0x4a   :  { %117 = vst.msk [vmem:[#allocation3 + $0xa1] sm:$0x1] %vm106_vm6, %v3589_v26 }
  0x4b   :  { %118 = vst.msk [vmem:[#allocation3 + $0xb1] sm:$0x1] %vm106_vm6, %v3589_v26 }
  0x4c   :  { %119 = vst.msk [vmem:[#allocation3 + $0xc1] sm:$0x1] %vm106_vm6, %v3589_v26 }
  0x4d   :  { %120 = vst.msk [vmem:[#allocation3 + $0xd1] sm:$0x1] %vm106_vm6, %v3589_v26 }
  0x4e   :  { %121 = vst.msk [vmem:[#allocation3 + $0xe1] sm:$0x1] %vm106_vm6, %v3589_v26 }
  0x4f   :  { %122 = vst.msk [vmem:[#allocation3 + $0xf1] sm:$0x1] %vm106_vm6, %v3589_v26 }
  0x50   :  { %3190 = vmatmul.msk.f32.gmra.mxu0 %vm95_vm0, %v174_v20  ;;  %3206 = vmatmul.msk.f32.gmra.mxu1 %vm95_vm0, %v156_v21  ;;  %123 = vst.msk [vmem:[#allocation3 + $0x101] sm:$0x1] %vm106_vm6, %v3589_v26 }
  0x51   :  { %124 = vst.msk [vmem:[#allocation3 + $0x111] sm:$0x1] %vm106_vm6, %v3589_v26 }
  0x52   :  { %125 = vst.msk [vmem:[#allocation3 + $0x121] sm:$0x1] %vm106_vm6, %v3589_v26 }
  0x53   :  { %126 = vst.msk [vmem:[#allocation3 + $0x131] sm:$0x1] %vm106_vm6, %v3589_v26 }
  0x54   :  { %127 = vst.msk [vmem:[#allocation3 + $0xa] sm:$0x1] %vm106_vm6, %v3589_v26 }
  0x55   :  { %128 = vst.msk [vmem:[#allocation3 + $0x1a] sm:$0x1] %vm106_vm6, %v3589_v26 }
  0x56   :  { %129 = vst.msk [vmem:[#allocation3 + $0x2a] sm:$0x1] %vm106_vm6, %v3589_v26 }
  0x57   :  { %130 = vst.msk [vmem:[#allocation3 + $0x3a] sm:$0x1] %vm106_vm6, %v3589_v26 }
  0x58   :  { %3191 = vmatmul.msk.f32.gmra.mxu0 %vm95_vm0, %v175_v22  ;;  %3207 = vmatmul.msk.f32.gmra.mxu1 %vm95_vm0, %v157_v23  ;;  %131 = vst.msk [vmem:[#allocation3 + $0x4a] sm:$0x1] %vm106_vm6, %v3589_v26 }
  0x59   :  { %132 = vst.msk [vmem:[#allocation3 + $0x5a] sm:$0x1] %vm106_vm6, %v3589_v26 }
  0x5a   :  { %133 = vst.msk [vmem:[#allocation3 + $0x6a] sm:$0x1] %vm106_vm6, %v3589_v26 }
  0x5b   :  { %134 = vst.msk [vmem:[#allocation3 + $0x7a] sm:$0x1] %vm106_vm6, %v3589_v26 }
  0x5c   :  { %135 = vst.msk [vmem:[#allocation3 + $0x8a] sm:$0x1] %vm106_vm6, %v3589_v26 }
  0x5d   :  { %136 = vst.msk [vmem:[#allocation3 + $0x9a] sm:$0x1] %vm106_vm6, %v3589_v26 }
  0x5e   :  { %137 = vst.msk [vmem:[#allocation3 + $0xaa] sm:$0x1] %vm106_vm6, %v3589_v26 }
  0x5f   :  { %138 = vst.msk [vmem:[#allocation3 + $0xba] sm:$0x1] %vm106_vm6, %v3589_v26 }
  0x60   :  { %3192 = vmatmul.msk.f32.gmra.mxu0 %vm95_vm0, %v176_v24  ;;  %3208 = vmatmul.msk.f32.gmra.mxu1 %vm95_vm0, %v158_v25  ;;  %139 = vst.msk [vmem:[#allocation3 + $0xca] sm:$0x1] %vm106_vm6, %v3589_v26 }
  0x61   :  { %140 = vst.msk [vmem:[#allocation3 + $0xda] sm:$0x1] %vm106_vm6, %v3589_v26 }
  0x62   :  { %141 = vst.msk [vmem:[#allocation3 + $0xea] sm:$0x1] %vm106_vm6, %v3589_v26 }
  0x63   :  { %142 = vst.msk [vmem:[#allocation3 + $0xfa] sm:$0x1] %vm106_vm6, %v3589_v26 }
  0x64   :  { %143 = vst.msk [vmem:[#allocation3 + $0x10a] sm:$0x1] %vm106_vm6, %v3589_v26 }
  0x65   :  { %144 = vst.msk [vmem:[#allocation3 + $0x11a] sm:$0x1] %vm106_vm6, %v3589_v26 }
  0x66   :  { %145 = vst.msk [vmem:[#allocation3 + $0x12a] sm:$0x1] %vm106_vm6, %v3589_v26 }
  0x67   :  { %146 = vst.msk [vmem:[#allocation3 + $0x13a] sm:$0x1] %vm106_vm6, %v3589_v26 }
  0x68   :  { %3193 = vmatmul.msk.f32.gmra.mxu0 %vm95_vm0, %v177_v27  ;;  %3209 = vmatmul.msk.f32.gmra.mxu1 %vm95_vm0, %v159_v28 }
  0x70   :  { %3194 = vmatmul.msk.f32.gmra.mxu0 %vm95_vm0, %v178_v33  ;;  %3210 = vmatmul.msk.f32.gmra.mxu1 %vm95_vm0, %v160_v34 }
  0x78   :  { %3195 = vmatmul.msk.f32.gmra.mxu0 %vm95_vm0, %v179_v38  ;;  %3211 = vmatmul.msk.f32.gmra.mxu1 %vm95_vm0, %v161_v39  ;;  %v471_v38 = vld [vmem:[#allocation2 + $0xa2] sm:$0xff] }
  0x79   :  { %v454_v39 = vld [vmem:[#allocation2 + $0xa1] sm:$0xff] }
  0x80   :  { %3196 = vmatmul.msk.f32.gmra.mxu0 %vm95_vm0, %v180_v40  ;;  %3212 = vmatmul.msk.f32.gmra.mxu1 %vm95_vm0, %v162_v41  ;;  %v722_v40 = vld [vmem:[#allocation2 + $0xa3] sm:$0xff] }
  0x85   :  { %v248_v43 = vpop.f32.mrf.mxu0  ;;  %v361_v44 = vpop.f32.mrf.mxu1 }
  0x86   :  { %v362_v45 = vadd.f32 %v361_v44, %v248_v43 }
  0x88   :  { %v413_v47 = vadd.f32 %v3774_v42, %v362_v45  ;;  %3250 = vmatmul.msk.f32.vlgmr.msrb.gmra.mxu0 %vm43_vm1, %v714_v46 }
  0x8a   :  { %430 = vst.msk [vmem:[#allocation2 + $0x12] sm:$0xff] %vm43_vm1, %v413_v47 }
  0x8d   :  { %v251_v48 = vpop.f32.mrf.mxu0  ;;  %v364_v49 = vpop.f32.mrf.mxu1 }
  0x8e   :  { %v365_v50 = vadd.f32 %v364_v49, %v251_v48 }
  0x90   :  { %v414_v51 = vadd.f32 %v3774_v42, %v365_v50 }
  0x91   :  { %v3806_v52 = vld [vmem:[#allocation2 + $0x12] sm:$0xff] }
  0x92   :  { %v447_v53 = vld [vmem:[#allocation2 + $0x11] sm:$0xff]  ;;  %3216 = vmatmul.msk.f32.gmra.mxu2 %vm43_vm1, %v3806_v52  ;;  %431 = vst.msk [vmem:[#allocation2 + $0x22] sm:$0xff] %vm43_vm1, %v414_v51 }
  0x93   :  { %v3808_v54 = vld [vmem:[#allocation2 + $0x13] sm:$0xff]  ;;  %3233 = vmatmul.msk.f32.gmra.mxu3 %vm43_vm1, %v447_v53  ;;  %3268 = vmatmul.msk.f32.vlgmr.msrb.gmra.mxu1 %vm43_vm1, %v447_v53 }
  0x94   :  { %3251 = vmatmul.msk.f32.gmra.mxu0 %vm43_vm1, %v3808_v54 }
  0x95   :  { %v254_v55 = vpop.f32.mrf.mxu0  ;;  %v367_v56 = vpop.f32.mrf.mxu1 }
  0x96   :  { %v368_v57 = vadd.f32 %v367_v56, %v254_v55 }
  0x98   :  { %v415_v58 = vadd.f32 %v3774_v42, %v368_v57 }
  0x99   :  { %v3823_v59 = vld [vmem:[#allocation2 + $0x22] sm:$0xff] }
  0x9a   :  { %432 = vst.msk [vmem:[#allocation2 + $0x32] sm:$0xff] %vm43_vm1, %v415_v58  ;;  %v3825_v60 = vld [vmem:[#allocation2 + $0x21] sm:$0xff]  ;;  %3217 = vmatmul.msk.f32.gmra.mxu2 %vm43_vm1, %v3823_v59 }
  0x9b   :  { %v3827_v61 = vld [vmem:[#allocation2 + $0x23] sm:$0xff]  ;;  %3234 = vmatmul.msk.f32.gmra.mxu3 %vm43_vm1, %v3825_v60  ;;  %3269 = vmatmul.msk.f32.gmra.mxu1 %vm43_vm1, %v3825_v60 }
  0x9c   :  { %3252 = vmatmul.msk.f32.gmra.mxu0 %vm43_vm1, %v3827_v61 }
  0x9d   :  { %v257_v62 = vpop.f32.mrf.mxu0  ;;  %v370_v63 = vpop.f32.mrf.mxu1 }
  0x9e   :  { %v371_v0 = vadd.f32 %v370_v63, %v257_v62 }
  0xa0   :  { %v416_v1 = vadd.f32 %v3774_v42, %v371_v0 }
  0xa1   :  { %v3838_v2 = vld [vmem:[#allocation2 + $0x32] sm:$0xff] }
  0xa2   :  { %v3840_v3 = vld [vmem:[#allocation2 + $0x31] sm:$0xff]  ;;  %433 = vst.msk [vmem:[#allocation2 + $0x42] sm:$0xff] %vm43_vm1, %v416_v1  ;;  %3218 = vmatmul.msk.f32.gmra.mxu2 %vm43_vm1, %v3838_v2 }
  0xa3   :  { %v3843_v4 = vld [vmem:[#allocation2 + $0x33] sm:$0xff]  ;;  %3235 = vmatmul.msk.f32.gmra.mxu3 %vm43_vm1, %v3840_v3  ;;  %3270 = vmatmul.msk.f32.gmra.mxu1 %vm43_vm1, %v3840_v3 }
  0xa4   :  { %3253 = vmatmul.msk.f32.gmra.mxu0 %vm43_vm1, %v3843_v4 }
  0xa5   :  { %v260_v5 = vpop.f32.mrf.mxu0  ;;  %v373_v6 = vpop.f32.mrf.mxu1 }
  0xa6   :  { %v374_v7 = vadd.f32 %v373_v6, %v260_v5 }
  0xa8   :  { %v417_v8 = vadd.f32 %v3774_v42, %v374_v7 }
  0xa9   :  { %v3854_v9 = vld [vmem:[#allocation2 + $0x42] sm:$0xff] }
  0xaa   :  { %v3856_v10 = vld [vmem:[#allocation2 + $0x41] sm:$0xff]  ;;  %434 = vst.msk [vmem:[#allocation2 + $0x52] sm:$0xff] %vm43_vm1, %v417_v8  ;;  %3219 = vmatmul.msk.f32.gmra.mxu2 %vm43_vm1, %v3854_v9 }
  0xab   :  { %v3859_v11 = vld [vmem:[#allocation2 + $0x43] sm:$0xff]  ;;  %3236 = vmatmul.msk.f32.gmra.mxu3 %vm43_vm1, %v3856_v10  ;;  %3271 = vmatmul.msk.f32.gmra.mxu1 %vm43_vm1, %v3856_v10 }
  0xac   :  { %3254 = vmatmul.msk.f32.gmra.mxu0 %vm43_vm1, %v3859_v11 }
  0xad   :  { %v263_v12 = vpop.f32.mrf.mxu0  ;;  %v376_v13 = vpop.f32.mrf.mxu1 }
  0xae   :  { %v377_v14 = vadd.f32 %v376_v13, %v263_v12  ;;  %v3302_v13 = vld [vmem:[%s5021_s3 + $0x14] sm:$0xf] }
  0xaf   :  { %3303 = vmatpush.msk.msrb.mxu3 %vm529_vm3, %v3302_v13 }
  0xb0   :  { %v418_v15 = vadd.f32 %v3774_v42, %v377_v14  ;;  %v3320_v14 = vld [vmem:[%s5021_s3 + $0x18] sm:$0xf] }
  0xb1   :  { %v3870_v16 = vld [vmem:[#allocation2 + $0x52] sm:$0xff]  ;;  %3321 = vmatpush.msk.msra.mxu0 %vm529_vm3, %v3320_v14 }
  0xb2   :  { %v3872_v17 = vld [vmem:[#allocation2 + $0x51] sm:$0xff]  ;;  %435 = vst.msk [vmem:[#allocation2 + $0x62] sm:$0xff] %vm43_vm1, %v418_v15  ;;  %3220 = vmatmul.msk.f32.gmra.mxu2 %vm43_vm1, %v3870_v16 }
  0xb3   :  { %v3875_v18 = vld [vmem:[#allocation2 + $0x53] sm:$0xff]  ;;  %3237 = vmatmul.msk.f32.gmra.mxu3 %vm43_vm1, %v3872_v17  ;;  %3272 = vmatmul.msk.f32.gmra.mxu1 %vm43_vm1, %v3872_v17 }
  0xb4   :  { %3255 = vmatmul.msk.f32.gmra.mxu0 %vm43_vm1, %v3875_v18 }
  0xb5   :  { %v266_v19 = vpop.f32.mrf.mxu0  ;;  %v379_v20 = vpop.f32.mrf.mxu1 }
  0xb6   :  { %v380_v21 = vadd.f32 %v379_v20, %v266_v19 }
  0xb8   :  { %v419_v22 = vadd.f32 %v3774_v42, %v380_v21 }
  0xb9   :  { %v3886_v23 = vld [vmem:[#allocation2 + $0x62] sm:$0xff] }
  0xba   :  { %v3888_v24 = vld [vmem:[#allocation2 + $0x61] sm:$0xff]  ;;  %436 = vst.msk [vmem:[#allocation2 + $0x72] sm:$0xff] %vm43_vm1, %v419_v22  ;;  %3221 = vmatmul.msk.f32.gmra.mxu2 %vm43_vm1, %v3886_v23 }
  0xbb   :  { %v3891_v25 = vld [vmem:[#allocation2 + $0x63] sm:$0xff]  ;;  %3238 = vmatmul.msk.f32.gmra.mxu3 %vm43_vm1, %v3888_v24  ;;  %3273 = vmatmul.msk.f32.gmra.mxu1 %vm43_vm1, %v3888_v24 }
  0xbc   :  { %3256 = vmatmul.msk.f32.gmra.mxu0 %vm43_vm1, %v3891_v25 }
  0xbd   :  { %v269_v27 = vpop.f32.mrf.mxu0  ;;  %v382_v28 = vpop.f32.mrf.mxu1 }
  0xbe   :  { %v383_v29 = vadd.f32 %v382_v28, %v269_v27 }
  0xc0   :  { %v420_v30 = vadd.f32 %v3774_v42, %v383_v29  ;;  %v3356_v29 = vld [vmem:[%s5021_s3 + $0x20] sm:$0xf] }
  0xc1   :  { %v3902_v31 = vld [vmem:[#allocation2 + $0x72] sm:$0xff]  ;;  %3357 = vmatpush.msk.msra.mxu2 %vm529_vm3, %v3356_v29 }
  0xc2   :  { %v3904_v32 = vld [vmem:[#allocation2 + $0x71] sm:$0xff]  ;;  %437 = vst.msk [vmem:[#allocation2 + $0x82] sm:$0xff] %vm43_vm1, %v420_v30  ;;  %3222 = vmatmul.msk.f32.gmra.mxu2 %vm43_vm1, %v3902_v31  ;;  %v3338_v30 = vld [vmem:[%s5021_s3 + $0x1c] sm:$0xf] }
  0xc3   :  { %v3907_v33 = vld [vmem:[#allocation2 + $0x73] sm:$0xff]  ;;  %3239 = vmatmul.msk.f32.gmra.mxu3 %vm43_vm1, %v3904_v32  ;;  %3274 = vmatmul.msk.f32.gmra.mxu1 %vm43_vm1, %v3904_v32 }
  0xc4   :  { %3257 = vmatmul.msk.f32.gmra.mxu0 %vm43_vm1, %v3907_v33  ;;  %3339 = vmatpush.msk.msra.mxu1 %vm529_vm3, %v3338_v30 }
  0xc5   :  { %v272_v34 = vpop.f32.mrf.mxu0  ;;  %v385_v35 = vpop.f32.mrf.mxu1 }
  0xc6   :  { %v386_v36 = vadd.f32 %v385_v35, %v272_v34 }
  0xc8   :  { %v421_v37 = vadd.f32 %v3774_v42, %v386_v36 }
  0xc9   :  { %v3919_v41 = vld [vmem:[#allocation2 + $0x81] sm:$0xff] }
  0xca   :  { %438 = vst.msk [vmem:[#allocation2 + $0xb2] sm:$0xff] %vm43_vm1, %v421_v37  ;;  %3223 = vmatmul.msk.f32.gmra.mxu2 %vm43_vm1, %v471_v38 }
  0xcb   :  { %3240 = vmatmul.msk.f32.gmra.mxu3 %vm43_vm1, %v454_v39  ;;  %3275 = vmatmul.msk.f32.gmra.mxu1 %vm43_vm1, %v3919_v41 }
  0xcc   :  { %3258 = vmatmul.msk.f32.gmra.mxu0 %vm43_vm1, %v722_v40 }
  0xcd   :  { %v275_v43 = vpop.f32.mrf.mxu0  ;;  %v388_v44 = vpop.f32.mrf.mxu1 }
  0xce   :  { %v389_v45 = vadd.f32 %v388_v44, %v275_v43 }
  0xd0   :  { %v422_v46 = vadd.f32 %v3774_v42, %v389_v45 }
  0xd1   :  { %v3927_v47 = vld [vmem:[#allocation2 + $0xb2] sm:$0xff] }
  0xd2   :  { %v455_v48 = vld [vmem:[#allocation2 + $0xb1] sm:$0xff]  ;;  %439 = vst.msk [vmem:[#allocation2 + $0xc2] sm:$0xff] %vm43_vm1, %v422_v46  ;;  %3224 = vmatmul.msk.f32.gmra.mxu2 %vm43_vm1, %v3927_v47 }
  0xd3   :  { %v3930_v49 = vld [vmem:[#allocation2 + $0xb3] sm:$0xff]  ;;  %3241 = vmatmul.msk.f32.gmra.mxu3 %vm43_vm1, %v455_v48  ;;  %3276 = vmatmul.msk.f32.gmra.mxu1 %vm43_vm1, %v455_v48 }
  0xd4   :  { %3259 = vmatmul.msk.f32.gmra.mxu0 %vm43_vm1, %v3930_v49 }
  0xd5   :  { %v278_v50 = vpop.f32.mrf.mxu0  ;;  %v391_v51 = vpop.f32.mrf.mxu1 }
  0xd6   :  { %v392_v53 = vadd.f32 %v391_v51, %v278_v50 }
  0xd8   :  { %v423_v55 = vadd.f32 %v3774_v42, %v392_v53 }
  0xd9   :  { %v3939_v56 = vld [vmem:[#allocation2 + $0xc2] sm:$0xff] }
  0xda   :  { %v3941_v57 = vld [vmem:[#allocation2 + $0xc1] sm:$0xff]  ;;  %440 = vst.msk [vmem:[#allocation2 + $0xd2] sm:$0xff] %vm43_vm1, %v423_v55  ;;  %3225 = vmatmul.msk.f32.gmra.mxu2 %vm43_vm1, %v3939_v56 }
  0xdb   :  { %v3944_v58 = vld [vmem:[#allocation2 + $0xc3] sm:$0xff]  ;;  %3242 = vmatmul.msk.f32.gmra.mxu3 %vm43_vm1, %v3941_v57  ;;  %3277 = vmatmul.msk.f32.gmra.mxu1 %vm43_vm1, %v3941_v57 }
  0xdc   :  { %3260 = vmatmul.msk.f32.gmra.mxu0 %vm43_vm1, %v3944_v58 }
  0xdd   :  { %v281_v62 = vpop.f32.mrf.mxu0  ;;  %v394_v63 = vpop.f32.mrf.mxu1 }
  0xde   :  { %v395_v0 = vadd.f32 %v394_v63, %v281_v62 }
  0xe0   :  { %v424_v1 = vadd.f32 %v3774_v42, %v395_v0 }
  0xe1   :  { %v3955_v5 = vld [vmem:[#allocation2 + $0xd2] sm:$0xff] }
  0xe2   :  { %v3957_v6 = vld [vmem:[#allocation2 + $0xd1] sm:$0xff]  ;;  %441 = vst.msk [vmem:[#allocation2 + $0xe2] sm:$0xff] %vm43_vm1, %v424_v1  ;;  %3226 = vmatmul.msk.f32.gmra.mxu2 %vm43_vm1, %v3955_v5 }
  0xe3   :  { %v3960_v7 = vld [vmem:[#allocation2 + $0xd3] sm:$0xff]  ;;  %3243 = vmatmul.msk.f32.gmra.mxu3 %vm43_vm1, %v3957_v6  ;;  %3278 = vmatmul.msk.f32.gmra.mxu1 %vm43_vm1, %v3957_v6 }
  0xe4   :  { %3261 = vmatmul.msk.f32.gmra.mxu0 %vm43_vm1, %v3960_v7 }
  0xe5   :  { %v284_v8 = vpop.f32.mrf.mxu0  ;;  %v397_v12 = vpop.f32.mrf.mxu1 }
  0xe6   :  { %v398_v15 = vadd.f32 %v397_v12, %v284_v8  ;;  %v4062_v8 = vpop.f32.mrf.mxu2  ;;  %v4064_v12 = vpop.f32.mrf.mxu3 }
  0xe8   :  { %v425_v19 = vadd.f32 %v3774_v42, %v398_v15 }
  0xe9   :  { %v3979_v20 = vld [vmem:[#allocation2 + $0xe2] sm:$0xff] }
  0xea   :  { %v3981_v21 = vld [vmem:[#allocation2 + $0xe1] sm:$0xff]  ;;  %442 = vst.msk [vmem:[#allocation2 + $0xf2] sm:$0xff] %vm43_vm1, %v425_v19  ;;  %3227 = vmatmul.msk.f32.gmra.mxu2 %vm43_vm1, %v3979_v20 }
  0xeb   :  { %v3984_v22 = vld [vmem:[#allocation2 + $0xe3] sm:$0xff]  ;;  %3244 = vmatmul.msk.f32.gmra.mxu3 %vm43_vm1, %v3981_v21  ;;  %3279 = vmatmul.msk.f32.gmra.mxu1 %vm43_vm1, %v3981_v21 }
  0xec   :  { %3262 = vmatmul.msk.f32.gmra.mxu0 %vm43_vm1, %v3984_v22 }
  0xed   :  { %v287_v27 = vpop.f32.mrf.mxu0  ;;  %v400_v28 = vpop.f32.mrf.mxu1 }
  0xee   :  { %v401_v34 = vadd.f32 %v400_v28, %v287_v27 }
  0xf0   :  { %v426_v35 = vadd.f32 %v3774_v42, %v401_v34 }
  0xf1   :  { %v4003_v36 = vld [vmem:[#allocation2 + $0xf2] sm:$0xff] }
  0xf2   :  { %v4005_v37 = vld [vmem:[#allocation2 + $0xf1] sm:$0xff]  ;;  %443 = vst.msk [vmem:[#allocation2 + $0x102] sm:$0xff] %vm43_vm1, %v426_v35  ;;  %3228 = vmatmul.msk.f32.gmra.mxu2 %vm43_vm1, %v4003_v36 }
  0xf3   :  { %v4008_v38 = vld [vmem:[#allocation2 + $0xf3] sm:$0xff]  ;;  %3245 = vmatmul.msk.f32.gmra.mxu3 %vm43_vm1, %v4005_v37  ;;  %3280 = vmatmul.msk.f32.gmra.mxu1 %vm43_vm1, %v4005_v37 }
  0xf4   :  { %3263 = vmatmul.msk.f32.gmra.mxu0 %vm43_vm1, %v4008_v38 }
  0xf5   :  { %v290_v39 = vpop.f32.mrf.mxu0  ;;  %v403_v40 = vpop.f32.mrf.mxu1 }
  0xf6   :  { %v404_v43 = vadd.f32 %v403_v40, %v290_v39 }
  0xf8   :  { %v427_v44 = vadd.f32 %v3774_v42, %v404_v43 }
  0xf9   :  { %v4019_v45 = vld [vmem:[#allocation2 + $0x102] sm:$0xff] }
  0xfa   :  { %v4021_v46 = vld [vmem:[#allocation2 + $0x101] sm:$0xff]  ;;  %444 = vst.msk [vmem:[#allocation2 + $0x112] sm:$0xff] %vm43_vm1, %v427_v44  ;;  %3229 = vmatmul.msk.f32.gmra.mxu2 %vm43_vm1, %v4019_v45 }
  0xfb   :  { %v4024_v48 = vld [vmem:[#allocation2 + $0x103] sm:$0xff]  ;;  %3246 = vmatmul.msk.f32.gmra.mxu3 %vm43_vm1, %v4021_v46  ;;  %3281 = vmatmul.msk.f32.gmra.mxu1 %vm43_vm1, %v4021_v46 }
  0xfc   :  { %3264 = vmatmul.msk.f32.gmra.mxu0 %vm43_vm1, %v4024_v48 }
  0xfd   :  { %v293_v50 = vpop.f32.mrf.mxu0  ;;  %v406_v51 = vpop.f32.mrf.mxu1 }
  0xfe   :  { %v407_v53 = vadd.f32 %v406_v51, %v293_v50 }
 0x100   :  { %v428_v55 = vadd.f32 %v3774_v42, %v407_v53 }
 0x101   :  { %v4035_v62 = vld [vmem:[#allocation2 + $0x112] sm:$0xff] }
 0x102   :  { %v4037_v63 = vld [vmem:[#allocation2 + $0x111] sm:$0xff]  ;;  %445 = vst.msk [vmem:[#allocation2 + $0x122] sm:$0xff] %vm43_vm1, %v428_v55  ;;  %3230 = vmatmul.msk.f32.gmra.mxu2 %vm43_vm1, %v4035_v62 }
 0x103   :  { %v4040_v0 = vld [vmem:[#allocation2 + $0x113] sm:$0xff]  ;;  %3247 = vmatmul.msk.f32.gmra.mxu3 %vm43_vm1, %v4037_v63  ;;  %3282 = vmatmul.msk.f32.gmra.mxu1 %vm43_vm1, %v4037_v63 }
 0x104   :  { %3265 = vmatmul.msk.f32.gmra.mxu0 %vm43_vm1, %v4040_v0  ;;  %v1322_v55 = vld [vmem:[#allocation2 + $0x91] sm:$0xff] }
 0x105   :  { %v4050_v42 = vpop.f32.mrf.mxu0 }
 0x109   :  { %v4052_v1 = vld [vmem:[#allocation2 + $0x121] sm:$0xff] }
 0x10a   :  { %3286 = vmatmul.msk.f32.vlgmr.msrb.gmra.mxu2 %vm43_vm1, %v3806_v52 }
 0x10b   :  { %3304 = vmatmul.msk.f32.vlgmr.msrb.gmra.mxu3 %vm43_vm1, %v3808_v54  ;;  %3283 = vmatmul.msk.f32.gmra.mxu1 %vm43_vm1, %v4052_v1 }
 0x10c   :  { %3322 = vmatmul.msk.f32.vlgmr.msra.gmra.mxu0 %vm43_vm1, %v3825_v60 }
 0x111   :  { %v803_v13 = vpop.f32.mrf.mxu0 }
 0x112   :  { %3287 = vmatmul.msk.f32.gmra.mxu2 %vm43_vm1, %v3823_v59 }
 0x113   :  { %3305 = vmatmul.msk.f32.gmra.mxu3 %vm43_vm1, %v3827_v61  ;;  %3340 = vmatmul.msk.f32.vlgmr.msra.gmra.mxu1 %vm43_vm1, %v3823_v59 }
 0x114   :  { %3323 = vmatmul.msk.f32.gmra.mxu0 %vm43_vm1, %v3840_v3 }
 0x115   :  { %v553_v52 = vpop.f32.mrf.mxu2 }
 0x116   :  { %v669_v54 = vpop.f32.mrf.mxu3 }
 0x117   :  { %v670_v60 = vadd.f32 %v669_v54, %v553_v52  ;;  %v4126_v52 = vld [vmem:[#allocation2 + $0x83] sm:$0xff] }
 0x119   :  { %v4074_v14 = vadd.f32 %v803_v13, %v670_v60  ;;  %v806_v15 = vpop.f32.mrf.mxu0  ;;  %v1021_v13 = vld [vmem:[#allocation2 + $0x82] sm:$0xff] }
 0x11a   :  { %3288 = vmatmul.msk.f32.gmra.mxu2 %vm43_vm1, %v3838_v2 }
 0x11b   :  { %3306 = vmatmul.msk.f32.gmra.mxu3 %vm43_vm1, %v3843_v4  ;;  %3341 = vmatmul.msk.f32.gmra.mxu1 %vm43_vm1, %v3838_v2 }
 0x11c   :  { %3324 = vmatmul.msk.f32.gmra.mxu0 %vm43_vm1, %v3856_v10 }
 0x11d   :  { %v556_v3 = vpop.f32.mrf.mxu2 }
 0x11e   :  { %v672_v59 = vpop.f32.mrf.mxu3 }
 0x11f   :  { %v673_v19 = vadd.f32 %v672_v59, %v556_v3  ;;  %v1472_v59 = vld [vmem:[#allocation2 + $0x92] sm:$0xff] }
 0x121   :  { %v809_v27 = vpop.f32.mrf.mxu0  ;;  %v4084_v28 = vadd.f32 %v806_v15, %v673_v19 }
 0x122   :  { %3289 = vmatmul.msk.f32.gmra.mxu2 %vm43_vm1, %v3854_v9 }
 0x123   :  { %3307 = vmatmul.msk.f32.gmra.mxu3 %vm43_vm1, %v3859_v11  ;;  %3342 = vmatmul.msk.f32.gmra.mxu1 %vm43_vm1, %v3854_v9 }
 0x124   :  { %3325 = vmatmul.msk.f32.gmra.mxu0 %vm43_vm1, %v3872_v17 }
 0x125   :  { %v559_v10 = vpop.f32.mrf.mxu2 }
 0x126   :  { %v675_v2 = vpop.f32.mrf.mxu3 }
 0x127   :  { %v676_v29 = vadd.f32 %v675_v2, %v559_v10  ;;  %v1330_v10 = vld [vmem:[#allocation2 + $0x131] sm:$0xff] }
 0x129   :  { %v812_v30 = vpop.f32.mrf.mxu0  ;;  %v4094_v34 = vadd.f32 %v809_v27, %v676_v29  ;;  %v1480_v29 = vld [vmem:[#allocation2 + $0x132] sm:$0xff] }
 0x12a   :  { %3290 = vmatmul.msk.f32.gmra.mxu2 %vm43_vm1, %v3870_v16 }
 0x12b   :  { %3308 = vmatmul.msk.f32.gmra.mxu3 %vm43_vm1, %v3875_v18  ;;  %3343 = vmatmul.msk.f32.gmra.mxu1 %vm43_vm1, %v3870_v16 }
 0x12c   :  { %3326 = vmatmul.msk.f32.gmra.mxu0 %vm43_vm1, %v3888_v24 }
 0x12d   :  { %v562_v17 = vpop.f32.mrf.mxu2 }
 0x12e   :  { %v678_v9 = vpop.f32.mrf.mxu3 }
 0x12f   :  { %v679_v35 = vadd.f32 %v678_v9, %v562_v17 }
 0x131   :  { %v4104_v39 = vadd.f32 %v812_v30, %v679_v35  ;;  %v815_v40 = vpop.f32.mrf.mxu0 }
 0x132   :  { %3291 = vmatmul.msk.f32.gmra.mxu2 %vm43_vm1, %v3886_v23 }
 0x133   :  { %3309 = vmatmul.msk.f32.gmra.mxu3 %vm43_vm1, %v3891_v25  ;;  %3344 = vmatmul.msk.f32.gmra.mxu1 %vm43_vm1, %v3886_v23 }
 0x134   :  { %3327 = vmatmul.msk.f32.gmra.mxu0 %vm43_vm1, %v3904_v32 }
 0x135   :  { %v565_v24 = vpop.f32.mrf.mxu2 }
 0x136   :  { %v681_v16 = vpop.f32.mrf.mxu3 }
 0x137   :  { %v682_v43 = vadd.f32 %v681_v16, %v565_v24 }
 0x139   :  { %v4114_v44 = vadd.f32 %v815_v40, %v682_v43  ;;  %v818_v32 = vpop.f32.mrf.mxu0 }
 0x13a   :  { %3292 = vmatmul.msk.f32.gmra.mxu2 %vm43_vm1, %v3902_v31 }
 0x13b   :  { %3310 = vmatmul.msk.f32.gmra.mxu3 %vm43_vm1, %v3907_v33  ;;  %3345 = vmatmul.msk.f32.gmra.mxu1 %vm43_vm1, %v3902_v31  ;;  %v4133_v31 = vpop.f32.mrf.mxu1 }
 0x13c   :  { %3328 = vmatmul.msk.f32.gmra.mxu0 %vm43_vm1, %v3919_v41 }
 0x13d   :  { %v568_v50 = vpop.f32.mrf.mxu2 }
 0x13e   :  { %v684_v23 = vpop.f32.mrf.mxu3 }
 0x13f   :  { %v685_v51 = vadd.f32 %v684_v23, %v568_v50 }
 0x141   :  { %v4124_v53 = vadd.f32 %v818_v32, %v685_v51  ;;  %v821_v15 = vpop.f32.mrf.mxu0 }
 0x142   :  { %3293 = vmatmul.msk.f32.gmra.mxu2 %vm43_vm1, %v1021_v13 }
 0x143   :  { %3311 = vmatmul.msk.f32.gmra.mxu3 %vm43_vm1, %v4126_v52  ;;  %3346 = vmatmul.msk.f32.gmra.mxu1 %vm43_vm1, %v1021_v13  ;;  %v953_v27 = vpop.f32.mrf.mxu1 }
 0x144   :  { %3329 = vmatmul.msk.f32.gmra.mxu0 %vm43_vm1, %v1322_v55  ;;  %v999_v17 = vadd.f32 %v953_v27, %v4074_v14 }
 0x145   :  { %v571_v41 = vpop.f32.mrf.mxu2 }
 0x146   :  { %v687_v54 = vpop.f32.mrf.mxu3 }
 0x147   :  { %v688_v60 = vadd.f32 %v687_v54, %v571_v41 }
 0x149   :  { %v4135_v3 = vadd.f32 %v821_v15, %v688_v60  ;;  %v4232_v24 = vpop.f32.mrf.mxu0 }
 0x14a   :  { %3294 = vmatmul.msk.f32.gmra.mxu2 %vm43_vm1, %v3927_v47 }
 0x14b   :  { %3312 = vmatmul.msk.f32.gmra.mxu3 %vm43_vm1, %v3930_v49  ;;  %3347 = vmatmul.msk.f32.gmra.mxu1 %vm43_vm1, %v1472_v59  ;;  %v956_v49 = vpop.f32.mrf.mxu1 }
 0x14c   :  { %3330 = vmatmul.msk.f32.gmra.mxu0 %vm43_vm1, %v3941_v57 }
 0x14d   :  { %v4144_v19 = vpop.f32.mrf.mxu2 }
 0x14e   :  { %v4226_v9 = vpop.f32.mrf.mxu3 }
 0x151   :  { %v4244_v50 = vpop.f32.mrf.mxu0 }
 0x152   :  { %3295 = vmatmul.msk.f32.gmra.mxu2 %vm43_vm1, %v3939_v56 }
 0x153   :  { %3313 = vmatmul.msk.f32.gmra.mxu3 %vm43_vm1, %v3944_v58  ;;  %3348 = vmatmul.msk.f32.gmra.mxu1 %vm43_vm1, %v3939_v56  ;;  %v959_v56 = vpop.f32.mrf.mxu1 }
 0x154   :  { %3331 = vmatmul.msk.f32.gmra.mxu0 %vm43_vm1, %v3957_v6  ;;  %v1001_v14 = vadd.f32 %v959_v56, %v4094_v34 }
 0x155   :  { %v4154_v47 = vpop.f32.mrf.mxu2 }
 0x15a   :  { %3296 = vmatmul.msk.f32.gmra.mxu2 %vm43_vm1, %v3955_v5 }
 0x15b   :  { %3314 = vmatmul.msk.f32.gmra.mxu3 %vm43_vm1, %v3960_v7  ;;  %3349 = vmatmul.msk.f32.gmra.mxu1 %vm43_vm1, %v3955_v5  ;;  %v962_v5 = vpop.f32.mrf.mxu1 }
 0x15c   :  { %3332 = vmatmul.msk.f32.gmra.mxu0 %vm43_vm1, %v3981_v21  ;;  %v1002_v55 = vadd.f32 %v962_v5, %v4104_v39  ;;  %v1622_v5 = vld [vmem:[#allocation2 + $0x93] sm:$0xff] }
 0x15d   :  { %v4164_v57 = vpop.f32.mrf.mxu2 }
 0x162   :  { %3297 = vmatmul.msk.f32.gmra.mxu2 %vm43_vm1, %v3979_v20 }
 0x163   :  { %3315 = vmatmul.msk.f32.gmra.mxu3 %vm43_vm1, %v3984_v22  ;;  %3350 = vmatmul.msk.f32.gmra.mxu1 %vm43_vm1, %v3979_v20  ;;  %v3374_v20 = vld [vmem:[%s5023_s5 + $0x8] sm:$0xff] }
 0x164   :  { %3333 = vmatmul.msk.f32.gmra.mxu0 %vm43_vm1, %v4005_v37  ;;  %1916 = vmatpush.msra.mxu3 %v3374_v20  ;;  %v965_v37 = vpop.f32.mrf.mxu1 }
 0x165   :  { %v4174_v6 = vpop.f32.mrf.mxu2  ;;  %v1003_v60 = vadd.f32 %v965_v37, %v4114_v44 }
 0x16a   :  { %3298 = vmatmul.msk.f32.gmra.mxu2 %vm43_vm1, %v4003_v36 }
 0x16b   :  { %3316 = vmatmul.msk.f32.gmra.mxu3 %vm43_vm1, %v4008_v38  ;;  %3351 = vmatmul.msk.f32.gmra.mxu1 %vm43_vm1, %v4003_v36 }
 0x16c   :  { %3334 = vmatmul.msk.f32.gmra.mxu0 %vm43_vm1, %v4021_v46  ;;  %v1029_v46 = vld [vmem:[#allocation2 + $0x122] sm:$0xff]  ;;  %v968_v2 = vpop.f32.mrf.mxu1 }
 0x16d   :  { %v4184_v21 = vpop.f32.mrf.mxu2  ;;  %v1004_v27 = vadd.f32 %v968_v2, %v4124_v53 }
 0x172   :  { %3299 = vmatmul.msk.f32.gmra.mxu2 %vm43_vm1, %v4019_v45 }
 0x173   :  { %3317 = vmatmul.msk.f32.gmra.mxu3 %vm43_vm1, %v4024_v48  ;;  %3352 = vmatmul.msk.f32.gmra.mxu1 %vm43_vm1, %v4019_v45 }
 0x174   :  { %3335 = vmatmul.msk.f32.gmra.mxu0 %vm43_vm1, %v4037_v63  ;;  %v4209_v63 = vld [vmem:[#allocation2 + $0x123] sm:$0xff] }
 0x175   :  { %v4197_v36 = vpop.f32.mrf.mxu2 }
 0x17a   :  { %3300 = vmatmul.msk.f32.gmra.mxu2 %vm43_vm1, %v4035_v62 }
 0x17b   :  { %3318 = vmatmul.msk.f32.gmra.mxu3 %vm43_vm1, %v4040_v0  ;;  %3353 = vmatmul.msk.f32.gmra.mxu1 %vm43_vm1, %v4035_v62 }
 0x17c   :  { %3336 = vmatmul.msk.f32.gmra.mxu0 %vm43_vm1, %v4052_v1  ;;  %v971_v1 = vpop.f32.mrf.mxu1 }
 0x17d   :  { %v4207_v45 = vpop.f32.mrf.mxu2  ;;  %v1005_v20 = vadd.f32 %v971_v1, %v4135_v3 }
 0x182   :  { %3301 = vmatmul.msk.f32.gmra.mxu2 %vm43_vm1, %v1029_v46 }
 0x183   :  { %3319 = vmatmul.msk.f32.gmra.mxu3 %vm43_vm1, %v4209_v63  ;;  %3354 = vmatmul.msk.f32.gmra.mxu1 %vm43_vm1, %v1029_v46 }
 0x184   :  { %3337 = vmatmul.msk.f32.gmra.mxu0 %vm43_vm1, %v1330_v10  ;;  %v4235_v16 = vpop.f32.mrf.mxu1 }
 0x185   :  { %v4216_v62 = vpop.f32.mrf.mxu2 }
 0x18a   :  { %3358 = vmatmul.msk.f32.vlgmr.msra.gmra.mxu2 %vm43_vm1, %v3827_v61  ;;  %v1000_v61 = vadd.f32 %v956_v49, %v4084_v28 }
 0x18b   :  { %3355 = vmatmul.msk.f32.gmra.mxu1 %vm43_vm1, %v1480_v29 }
 0x18c   :  { %v4248_v51 = vpop.f32.mrf.mxu1 }
 0x18d   :  { %v4221_v30 = vpop.f32.mrf.mxu2 }
 0x192   :  { %3359 = vmatmul.msk.f32.gmra.mxu2 %vm43_vm1, %v3843_v4  ;;  %v4239_v4 = vpop.f32.mrf.mxu3 }
 0x194   :  { %v4259_v34 = vpop.f32.mrf.mxu1 }
 0x195   :  { %v1103_v35 = vpop.f32.mrf.mxu2 }
 0x196   :  { %v4228_v40 = vadd.f32 %v1103_v35, %v999_v17 }
 0x19a   :  { %3360 = vmatmul.msk.f32.gmra.mxu2 %vm43_vm1, %v3859_v11  ;;  %v4250_v28 = vpop.f32.mrf.mxu3 }
 0x19c   :  { %v4272_v39 = vpop.f32.mrf.mxu1 }
 0x19d   :  { %v1106_v43 = vpop.f32.mrf.mxu2 }
 0x19e   :  { %v4237_v32 = vadd.f32 %v1106_v43, %v1000_v61 }
 0x1a2   :  { %3361 = vmatmul.msk.f32.gmra.mxu2 %vm43_vm1, %v3875_v18  ;;  %v4257_v18 = vpop.f32.mrf.mxu0  ;;  %v4263_v54 = vpop.f32.mrf.mxu3 }
 0x1a4   :  { %v4283_v37 = vpop.f32.mrf.mxu1 }
 0x1a5   :  { %v1109_v23 = vpop.f32.mrf.mxu2 }
 0x1a6   :  { %v4246_v11 = vadd.f32 %v1109_v23, %v1001_v14 }
 0x1aa   :  { %3362 = vmatmul.msk.f32.gmra.mxu2 %vm43_vm1, %v3891_v25  ;;  %v4268_v25 = vpop.f32.mrf.mxu0  ;;  %v4275_v49 = vpop.f32.mrf.mxu3 }
 0x1ac   :  { %v4295_v29 = vpop.f32.mrf.mxu1 }
 0x1ad   :  { %v1112_v13 = vpop.f32.mrf.mxu2 }
 0x1ae   :  { %v4255_v41 = vadd.f32 %v1112_v13, %v1002_v55 }
 0x1b2   :  { %3363 = vmatmul.msk.f32.gmra.mxu2 %vm43_vm1, %v3907_v33  ;;  %v4280_v44 = vpop.f32.mrf.mxu0  ;;  %v4287_v10 = vpop.f32.mrf.mxu3 }
 0x1b4   :  { %v4305_v35 = vpop.f32.mrf.mxu1 }
 0x1b5   :  { %v1115_v15 = vpop.f32.mrf.mxu2 }
 0x1b6   :  { %v4266_v59 = vadd.f32 %v1115_v15, %v1003_v60  ;;  %v3407_v60 = vld [vmem:[%s5023_s5 + $0x10] sm:$0xff]  ;;  %v3424_v15 = vld [vmem:[%s5023_s5 + $0x18] sm:$0xff] }
 0x1b7   :  { %2160 = vmatpush.msrb.mxu1 %v3407_v60  ;;  %2307 = vmatpush.msrb.mxu2 %v3424_v15 }
 0x1ba   :  { %3364 = vmatmul.msk.f32.gmra.mxu2 %vm43_vm1, %v4126_v52  ;;  %v4291_v53 = vpop.f32.mrf.mxu0  ;;  %v4297_v17 = vpop.f32.mrf.mxu3 }
 0x1bc   :  { %v4317_v14 = vpop.f32.mrf.mxu1 }
 0x1bd   :  { %v1118_v56 = vpop.f32.mrf.mxu2  ;;  %5037 = vst [vmem:[#allocation11_spill] sm:$0xff] %v4317_v14 }
 0x1be   :  { %v4277_v33 = vadd.f32 %v1118_v56, %v1004_v27 }
 0x1c2   :  { %3365 = vmatmul.msk.f32.gmra.mxu2 %vm43_vm1, %v1622_v5  ;;  %v4303_v1 = vpop.f32.mrf.mxu0  ;;  %v667_v5 = vadd.f32 %v4064_v12, %v4062_v8 }
 0x1c4   :  { %v848_v8 = vadd.f32 %v4050_v42, %v667_v5 }
 0x1c5   :  { %v1121_v46 = vpop.f32.mrf.mxu2 }
 0x1c6   :  { %v4285_v52 = vadd.f32 %v1121_v46, %v1005_v20  ;;  %v1818_v46 = vld [vmem:[#allocation3 + $0x1] sm:$0xff]  ;;  %v998_v15 = vadd.f32 %v4133_v31, %v848_v8 }
 0x1ca   :  { %3366 = vmatmul.msk.f32.gmra.mxu2 %vm43_vm1, %v3944_v58  ;;  %v4309_v58 = vpop.f32.mrf.mxu3  ;;  %v4313_v43 = vpop.f32.mrf.mxu0 }
 0x1cb   :  { %5036 = vst [vmem:[#allocation10_spill] sm:$0xff] %v4313_v43 }
 0x1cd   :  { %v4293_v2 = vpop.f32.mrf.mxu2 }
 0x1d2   :  { %3367 = vmatmul.msk.f32.gmra.mxu2 %vm43_vm1, %v3960_v7  ;;  %v1250_v7 = vpop.f32.mrf.mxu3  ;;  %v4323_v55 = vpop.f32.mrf.mxu0 }
 0x1d5   :  { %v4301_v3 = vpop.f32.mrf.mxu2 }
 0x1da   :  { %3368 = vmatmul.msk.f32.gmra.mxu2 %vm43_vm1, %v3984_v22  ;;  %v4326_v22 = vpop.f32.mrf.mxu1  ;;  %v1404_v27 = vpop.f32.mrf.mxu0 }
 0x1dd   :  { %v4311_v61 = vpop.f32.mrf.mxu2 }
 0x1e2   :  { %3369 = vmatmul.msk.f32.gmra.mxu2 %vm43_vm1, %v4008_v38  ;;  %v4332_v38 = vpop.f32.mrf.mxu3  ;;  %v1554_v20 = vpop.f32.mrf.mxu1 }
 0x1e3   :  { %v1407_v42 = vpop.f32.mrf.mxu0 }
 0x1e5   :  { %v4319_v23 = vpop.f32.mrf.mxu2 }
 0x1ea   :  { %3370 = vmatmul.msk.f32.gmra.mxu2 %vm43_vm1, %v4024_v48  ;;  %v1834_v48 = vld [vmem:[%s5023_s5] sm:$0xff]  ;;  %v1256_v60 = vpop.f32.mrf.mxu3  ;;  %v1557_v5 = vpop.f32.mrf.mxu1 }
 0x1eb   :  { %2029 = vmatpush.msrb.mxu0 %v1834_v48  ;;  %v3441_v48 = vld [vmem:[%s5023_s5 + $0x20] sm:$0xff] }
 0x1ec   :  { %3391 = vmatmul.msk.f32.vlgmr.msrb.gmra.mxu0 %vm95_vm0, %v1818_v46  ;;  %2454 = vmatpush.msrb.mxu3 %v3441_v48 }
 0x1ed   :  { %v4328_v13 = vpop.f32.mrf.mxu2 }
 0x1f2   :  { %3371 = vmatmul.msk.f32.gmra.mxu2 %vm43_vm1, %v4040_v0  ;;  %v1835_v0 = vld [vmem:[#allocation3 + $0x2] sm:$0xff]  ;;  %v1259_v31 = vpop.f32.mrf.mxu3  ;;  %v1560_v8 = vpop.f32.mrf.mxu1 }
 0x1f3   :  { %3375 = vmatmul.msk.f32.vlgmr.msra.gmra.mxu3 %vm95_vm0, %v1835_v0  ;;  %v1148_v0 = vadd.f32 %v4221_v30, %v998_v15  ;;  %v2079_v15 = vld [vmem:[#allocation3 + $0x3] sm:$0xff] }
 0x1f4   :  { %3408 = vmatmul.msk.f32.vlgmr.msrb.gmra.mxu1 %vm95_vm0, %v2079_v15  ;;  %v1300_v15 = vadd.f32 %v1256_v60, %v4237_v32 }
 0x1f5   :  { %v4356_v56 = vpop.f32.mrf.mxu2  ;;  %v1298_v46 = vadd.f32 %v1250_v7, %v1148_v0  ;;  %v1410_v7 = vpop.f32.mrf.mxu0  ;;  %v4428_v0 = vld [vmem:[%s5022_s4] ss:$0 sm:$0xff] }
 0x1f7   :  { %v1449_v48 = vadd.f32 %v4323_v55, %v1298_v46  ;;  %v1299_v55 = vadd.f32 %v4332_v38, %v4228_v40 }
 0x1f9   :  { %v1450_v40 = vadd.f32 %v1404_v27, %v1299_v55 }
 0x1fa   :  { %3372 = vmatmul.msk.f32.gmra.mxu2 %vm43_vm1, %v4209_v63  ;;  %v1630_v63 = vld [vmem:[#allocation2 + $0x133] sm:$0xff]  ;;  %v1262_v46 = vpop.f32.mrf.mxu3 }
 0x1fd   :  { %v4384_v12 = vpop.f32.mrf.mxu2 }
 0x1fe   :  { %5038 = vst [vmem:[#allocation12_spill] sm:$0xff] %v4384_v12  ;;  %v1301_v12 = vadd.f32 %v1259_v31, %v4246_v11 }
 0x202   :  { %3373 = vmatmul.msk.f32.gmra.mxu2 %vm43_vm1, %v1630_v63  ;;  %v1599_v63 = vadd.f32 %v4326_v22, %v1449_v48  ;;  %v1600_v48 = vadd.f32 %v1554_v20, %v1450_v40  ;;  %v1265_v55 = vpop.f32.mrf.mxu3 }
 0x205   :  { %v4405_v30 = vpop.f32.mrf.mxu2 }
 0x206   :  { %5039 = vst [vmem:[#allocation13_spill] sm:$0xff] %v4405_v30 }
 0x20a   :  { %v1268_v11 = vpop.f32.mrf.mxu3 }
 0x20d   :  { %v1701_v30 = vpop.f32.mrf.mxu2 }
 0x20e   :  { %v1749_v14 = vadd.f32 %v1701_v30, %v1599_v63  ;;  %v1413_v30 = vpop.f32.mrf.mxu0 }
 0x210   :  { %v1769_v22 = vadd.f32 %v4428_v0, %v1749_v14  ;;  %v1563_v14 = vpop.f32.mrf.mxu1 }
 0x212   :  { %v1785_v38 = vmax.f32 %v1769_v22, 0.0  ;;  %v1451_v22 = vadd.f32 %v1407_v42, %v1300_v15 }
 0x214   :  { %1802 = vst.msk [vmem:[#allocation3 + $0x12] sm:$0xff] %vm95_vm0, %v1785_v38  ;;  %v1601_v43 = vadd.f32 %v1557_v5, %v1451_v22 }
 0x215   :  { %v1704_v27 = vpop.f32.mrf.mxu2 }
 0x216   :  { %v1750_v63 = vadd.f32 %v1704_v27, %v1600_v48  ;;  %v1416_v42 = vpop.f32.mrf.mxu0  ;;  %v1452_v27 = vadd.f32 %v1410_v7, %v1301_v12 }
 0x218   :  { %v1770_v32 = vadd.f32 %v4428_v0, %v1750_v63  ;;  %v1566_v15 = vpop.f32.mrf.mxu1 }
 0x21a   :  { %v1786_v20 = vmax.f32 %v1770_v32, 0.0 }
 0x21b   :  { %v4459_v60 = vld [vmem:[#allocation3 + $0x12] sm:$0xff] }
 0x21c   :  { %5040 = vst [vmem:[#allocation14_spill] sm:$0xff] %v4459_v60  ;;  %v1819_v40 = vld [vmem:[#allocation3 + $0x11] sm:$0xff]  ;;  %3376 = vmatmul.msk.f32.gmra.mxu3 %vm95_vm0, %v4459_v60  ;;  %v1302_v60 = vadd.f32 %v1262_v46, %v4255_v41 }
 0x21d   :  { %v4461_v38 = vld [vmem:[#allocation3 + $0x13] sm:$0xff]  ;;  %1803 = vst.msk [vmem:[#allocation3 + $0x22] sm:$0xff] %vm95_vm0, %v1786_v20  ;;  %3392 = vmatmul.msk.f32.gmra.mxu0 %vm95_vm0, %v1819_v40  ;;  %3425 = vmatmul.msk.f32.vlgmr.msrb.gmra.mxu2 %vm95_vm0, %v1819_v40  ;;  %v1707_v26 = vpop.f32.mrf.mxu2  ;;  %v1602_v20 = vadd.f32 %v1560_v8, %v1452_v27 }
 0x21e   :  { %3409 = vmatmul.msk.f32.gmra.mxu1 %vm95_vm0, %v4461_v38  ;;  %v1751_v48 = vadd.f32 %v1707_v26, %v1601_v43  ;;  %v1419_v7 = vpop.f32.mrf.mxu0  ;;  %v1453_v8 = vadd.f32 %v1413_v30, %v1302_v60  ;;  %v1271_v26 = vpop.f32.mrf.mxu3 }
 0x220   :  { %v1771_v5 = vadd.f32 %v4428_v0, %v1751_v48  ;;  %v1569_v46 = vpop.f32.mrf.mxu1 }
 0x222   :  { %v1787_v31 = vmax.f32 %v1771_v5, 0.0 }
 0x224   :  { %v4472_v63 = vld [vmem:[#allocation3 + $0x22] sm:$0xff]  ;;  %1804 = vst.msk [vmem:[#allocation3 + $0x32] sm:$0xff] %vm95_vm0, %v1787_v31  ;;  %v1603_v31 = vadd.f32 %v1563_v14, %v1453_v8 }
 0x225   :  { %v4474_v22 = vld [vmem:[#allocation3 + $0x21] sm:$0xff]  ;;  %3377 = vmatmul.msk.f32.gmra.mxu3 %vm95_vm0, %v4472_v63  ;;  %v1710_v43 = vpop.f32.mrf.mxu2 }
 0x226   :  { %v4476_v32 = vld [vmem:[#allocation3 + $0x23] sm:$0xff]  ;;  %3393 = vmatmul.msk.f32.gmra.mxu0 %vm95_vm0, %v4474_v22  ;;  %3426 = vmatmul.msk.f32.gmra.mxu2 %vm95_vm0, %v4474_v22  ;;  %v1752_v12 = vadd.f32 %v1710_v43, %v1602_v20 }
 0x227   :  { %5041 = vst [vmem:[#allocation15_spill] sm:$0xff] %v4476_v32  ;;  %3410 = vmatmul.msk.f32.gmra.mxu1 %vm95_vm0, %v4476_v32  ;;  %v1303_v32 = vadd.f32 %v1265_v55, %v4266_v59  ;;  %v1422_v59 = vpop.f32.mrf.mxu0 }
 0x228   :  { %v1772_v41 = vadd.f32 %v4428_v0, %v1752_v12  ;;  %v1572_v43 = vpop.f32.mrf.mxu1 }
 0x229   :  { %v1454_v20 = vadd.f32 %v1416_v42, %v1303_v32  ;;  %v1274_v42 = vpop.f32.mrf.mxu3 }
 0x22a   :  { %v1788_v40 = vmax.f32 %v1772_v41, 0.0 }
 0x22b   :  { %v4489_v48 = vld [vmem:[#allocation3 + $0x32] sm:$0xff] }
 0x22c   :  { %v4491_v27 = vld [vmem:[#allocation3 + $0x31] sm:$0xff]  ;;  %1805 = vst.msk [vmem:[#allocation3 + $0x42] sm:$0xff] %vm95_vm0, %v1788_v40  ;;  %v1604_v40 = vadd.f32 %v1566_v15, %v1454_v20  ;;  %v691_v15 = vadd.f32 %v4226_v9, %v4144_v19 }
 0x22d   :  { %v4493_v5 = vld [vmem:[#allocation3 + $0x33] sm:$0xff]  ;;  %3378 = vmatmul.msk.f32.gmra.mxu3 %vm95_vm0, %v4489_v48  ;;  %v1713_v30 = vpop.f32.mrf.mxu2 }
 0x22e   :  { %5042 = vst [vmem:[#allocation16_spill] sm:$0xff] %v4493_v5  ;;  %3394 = vmatmul.msk.f32.gmra.mxu0 %vm95_vm0, %v4491_v27  ;;  %3427 = vmatmul.msk.f32.gmra.mxu2 %vm95_vm0, %v4491_v27  ;;  %v1753_v60 = vadd.f32 %v1713_v30, %v1603_v31  ;;  %v856_v30 = vadd.f32 %v4232_v24, %v691_v15 }
 0x22f   :  { %3411 = vmatmul.msk.f32.gmra.mxu1 %vm95_vm0, %v4493_v5  ;;  %v1304_v5 = vadd.f32 %v1268_v11, %v4277_v33  ;;  %v1425_v20 = vpop.f32.mrf.mxu0 }
 0x230   :  { %v1773_v14 = vadd.f32 %v4428_v0, %v1753_v60  ;;  %v1575_v19 = vpop.f32.mrf.mxu1  ;;  %v1006_v24 = vadd.f32 %v4235_v16, %v856_v30 }
 0x231   :  { %v1455_v11 = vadd.f32 %v1419_v7, %v1304_v5 }
 0x232   :  { %v1789_v55 = vmax.f32 %v1773_v14, 0.0  ;;  %v1156_v5 = vadd.f32 %v4293_v2, %v1006_v24  ;;  %v697_v2 = vadd.f32 %v4250_v28, %v4164_v57 }
 0x233   :  { %v4506_v12 = vld [vmem:[#allocation3 + $0x42] sm:$0xff] }
 0x234   :  { %5043 = vst [vmem:[#allocation17_spill] sm:$0xff] %v4506_v12  ;;  %v4508_v8 = vld [vmem:[#allocation3 + $0x41] sm:$0xff]  ;;  %v1306_v30 = vadd.f32 %v1274_v42, %v1156_v5 }
 0x235   :  { %5044 = vst [vmem:[#allocation18_spill] sm:$0xff] %v4508_v8  ;;  %v4510_v41 = vld [vmem:[#allocation3 + $0x43] sm:$0xff]  ;;  %3379 = vmatmul.msk.f32.gmra.mxu3 %vm95_vm0, %v4506_v12  ;;  %v1716_v32 = vpop.f32.mrf.mxu2  ;;  %v1605_v12 = vadd.f32 %v1569_v46, %v1455_v11  ;;  %v1277_v46 = vpop.f32.mrf.mxu3 }
 0x236   :  { %5045 = vst [vmem:[#allocation19_spill] sm:$0xff] %v4510_v41  ;;  %3395 = vmatmul.msk.f32.gmra.mxu0 %vm95_vm0, %v4508_v8  ;;  %3428 = vmatmul.msk.f32.gmra.mxu2 %vm95_vm0, %v4508_v8  ;;  %v1754_v33 = vadd.f32 %v1716_v32, %v1604_v40  ;;  %v1305_v8 = vadd.f32 %v1271_v26, %v4285_v52 }
 0x237   :  { %1806 = vst.msk [vmem:[#allocation3 + $0x52] sm:$0xff] %vm95_vm0, %v1789_v55  ;;  %3412 = vmatmul.msk.f32.gmra.mxu1 %vm95_vm0, %v4510_v41  ;;  %v694_v52 = vadd.f32 %v4239_v4, %v4154_v47  ;;  %v1428_v47 = vpop.f32.mrf.mxu0 }
 0x238   :  { %v1774_v31 = vadd.f32 %v4428_v0, %v1754_v33  ;;  %v1456_v26 = vadd.f32 %v1422_v59, %v1305_v8 }
 0x239   :  { %v857_v32 = vadd.f32 %v4244_v50, %v694_v52 }
 0x23a   :  { %v1790_v60 = vmax.f32 %v1774_v31, 0.0  ;;  %v1606_v16 = vadd.f32 %v1572_v43, %v1456_v26  ;;  %v1578_v43 = vpop.f32.mrf.mxu1 }
 0x23b   :  { %v1007_v50 = vadd.f32 %v4248_v51, %v857_v32 }
 0x23c   :  { %1807 = vst.msk [vmem:[#allocation3 + $0x62] sm:$0xff] %vm95_vm0, %v1790_v60 }
 0x23d   :  { %v1719_v9 = vpop.f32.mrf.mxu2  ;;  %v1157_v8 = vadd.f32 %v4301_v3, %v1007_v50  ;;  %v1280_v60 = vpop.f32.mrf.mxu3  ;;  %v2087_v50 = vld [vmem:[#allocation3 + $0xa3] sm:$0xff] }
 0x23e   :  { %v4526_v14 = vld [vmem:[#allocation3 + $0x52] sm:$0xff]  ;;  %v1755_v7 = vadd.f32 %v1719_v9, %v1605_v12  ;;  %v1457_v12 = vadd.f32 %v1425_v20, %v1306_v30  ;;  %v858_v9 = vadd.f32 %v4257_v18, %v697_v2  ;;  %v700_v18 = vadd.f32 %v4263_v54, %v4174_v6 }
 0x23f   :  { %v4528_v55 = vld [vmem:[#allocation3 + $0x51] sm:$0xff]  ;;  %3380 = vmatmul.msk.f32.gmra.mxu3 %vm95_vm0, %v4526_v14  ;;  %v1307_v5 = vadd.f32 %v1277_v46, %v1157_v8  ;;  %v1431_v20 = vpop.f32.mrf.mxu0 }
 0x240   :  { %v4530_v41 = vld [vmem:[#allocation3 + $0x53] sm:$0xff]  ;;  %3396 = vmatmul.msk.f32.gmra.mxu0 %vm95_vm0, %v4528_v55  ;;  %3429 = vmatmul.msk.f32.gmra.mxu2 %vm95_vm0, %v4528_v55  ;;  %v1775_v40 = vadd.f32 %v4428_v0, %v1755_v7  ;;  %v1607_v51 = vadd.f32 %v1575_v19, %v1457_v12  ;;  %v1008_v28 = vadd.f32 %v4259_v34, %v858_v9 }
 0x241   :  { %3413 = vmatmul.msk.f32.gmra.mxu1 %vm95_vm0, %v4530_v41  ;;  %v1458_v19 = vadd.f32 %v1428_v47, %v1307_v5  ;;  %v859_v30 = vadd.f32 %v4268_v25, %v700_v18  ;;  %v703_v25 = vadd.f32 %v4275_v49, %v4184_v21 }
 0x242   :  { %v1791_v15 = vmax.f32 %v1775_v40, 0.0  ;;  %v1158_v46 = vadd.f32 %v4311_v61, %v1008_v28  ;;  %v1581_v32 = vpop.f32.mrf.mxu1 }
 0x243   :  { %v4548_v33 = vld [vmem:[#allocation3 + $0x62] sm:$0xff]  ;;  %v1608_v34 = vadd.f32 %v1578_v43, %v1458_v19  ;;  %v1009_v54 = vadd.f32 %v4272_v39, %v859_v30 }
 0x244   :  { %v4550_v11 = vld [vmem:[#allocation3 + $0x61] sm:$0xff]  ;;  %1808 = vst.msk [vmem:[#allocation3 + $0x72] sm:$0xff] %vm95_vm0, %v1791_v15  ;;  %v1308_v12 = vadd.f32 %v1280_v60, %v1158_v46  ;;  %v860_v60 = vadd.f32 %v4280_v44, %v703_v25 }
 0x245   :  { %v4552_v31 = vld [vmem:[#allocation3 + $0x63] sm:$0xff]  ;;  %v1722_v4 = vpop.f32.mrf.mxu2  ;;  %v1283_v2 = vpop.f32.mrf.mxu3  ;;  %v1159_v43 = vadd.f32 %v4319_v23, %v1009_v54  ;;  %v706_v23 = vadd.f32 %v4287_v10, %v4197_v36 }
 0x246   :  { %v1756_v59 = vadd.f32 %v1722_v4, %v1606_v16  ;;  %v1843_v15 = vld [vmem:[#allocation3 + $0xa2] sm:$0xff]  ;;  %v1459_v47 = vadd.f32 %v1431_v20, %v1308_v12  ;;  %v1010_v44 = vadd.f32 %v4283_v37, %v860_v60 }
 0x247   :  { %3381 = vmatmul.msk.f32.gmra.mxu3 %vm95_vm0, %v4548_v33  ;;  %v1826_v16 = vld [vmem:[#allocation3 + $0xa1] sm:$0xff]  ;;  %v1309_v28 = vadd.f32 %v1283_v2, %v1159_v43  ;;  %v861_v46 = vadd.f32 %v4291_v53, %v706_v23 }
 0x248   :  { %3397 = vmatmul.msk.f32.gmra.mxu0 %vm95_vm0, %v4550_v11  ;;  %3430 = vmatmul.msk.f32.gmra.mxu2 %vm95_vm0, %v4550_v11  ;;  %v1776_v42 = vadd.f32 %v4428_v0, %v1756_v59  ;;  %v1609_v39 = vadd.f32 %v1581_v32, %v1459_v47  ;;  %v1160_v20 = vadd.f32 %v4328_v13, %v1010_v44  ;;  %v5047_v23 = vld [vmem:[#allocation10_spill] sm:$0xff] }
 0x249   :  { %3414 = vmatmul.msk.f32.gmra.mxu1 %vm95_vm0, %v4552_v31  ;;  %v1011_v53 = vadd.f32 %v4295_v29, %v861_v46  ;;  %v709_v13 = vadd.f32 %v4297_v17, %v4207_v45 }
 0x24a   :  { %v1792_v24 = vmax.f32 %v1776_v42, 0.0  ;;  %v1434_v42 = vpop.f32.mrf.mxu0 }
 0x24b   :  { %v4569_v52 = vld [vmem:[#allocation3 + $0x72] sm:$0xff]  ;;  %v1161_v12 = vadd.f32 %v4356_v56, %v1011_v53  ;;  %v862_v54 = vadd.f32 %v4303_v1, %v709_v13  ;;  %v3458_v56 = vld [vmem:[%s5023_s5 + $0x28] sm:$0xff] }
 0x24c   :  { %v4571_v7 = vld [vmem:[#allocation3 + $0x71] sm:$0xff]  ;;  %1809 = vst.msk [vmem:[#allocation3 + $0x82] sm:$0xff] %vm95_vm0, %v1792_v24  ;;  %v1584_v24 = vpop.f32.mrf.mxu1  ;;  %2601 = vmatpush.msra.mxu0 %v3458_v56 }
 0x24d   :  { %v4573_v26 = vld [vmem:[#allocation3 + $0x73] sm:$0xff]  ;;  %v1725_v57 = vpop.f32.mrf.mxu2  ;;  %v1286_v21 = vpop.f32.mrf.mxu3  ;;  %v1012_v60 = vadd.f32 %v4305_v35, %v862_v54 }
 0x24e   :  { %v1757_v3 = vadd.f32 %v1725_v57, %v1607_v51  ;;  %v3492_v1 = vld [vmem:[%s5023_s5 + $0x38] sm:$0xff] }
 0x24f   :  { %3382 = vmatmul.msk.f32.gmra.mxu3 %vm95_vm0, %v4569_v52  ;;  %2896 = vmatpush.msra.mxu2 %v3492_v1  ;;  %v5049_v53 = vld [vmem:[#allocation13_spill] sm:$0xff] }
 0x250   :  { %3398 = vmatmul.msk.f32.gmra.mxu0 %vm95_vm0, %v4571_v7  ;;  %3431 = vmatmul.msk.f32.gmra.mxu2 %vm95_vm0, %v4571_v7  ;;  %v1777_v40 = vadd.f32 %v4428_v0, %v1757_v3  ;;  %v1460_v3 = vadd.f32 %v1434_v42, %v1309_v28  ;;  %v3475_v42 = vld [vmem:[%s5023_s5 + $0x30] sm:$0xff] }
 0x251   :  { %3415 = vmatmul.msk.f32.gmra.mxu1 %vm95_vm0, %v4573_v26  ;;  %v5046_v28 = vld [vmem:[#allocation12_spill] sm:$0xff] }
 0x252   :  { %v1793_v4 = vmax.f32 %v1777_v40, 0.0  ;;  %v1437_v32 = vpop.f32.mrf.mxu0  ;;  %v1610_v37 = vadd.f32 %v1584_v24, %v1460_v3  ;;  %2749 = vmatpush.msra.mxu1 %v3475_v42 }
 0x253   :  { %v4590_v59 = vld [vmem:[#allocation3 + $0x81] sm:$0xff] }
 0x254   :  { %1810 = vst.msk [vmem:[#allocation3 + $0xb2] sm:$0xff] %vm95_vm0, %v1793_v4  ;;  %v1310_v4 = vadd.f32 %v1286_v21, %v1160_v20  ;;  %v1587_v36 = vpop.f32.mrf.mxu1  ;;  %v1162_v21 = vadd.f32 %v5046_v28, %v1012_v60 }
 0x255   :  { %v1728_v6 = vpop.f32.mrf.mxu2  ;;  %v1289_v2 = vpop.f32.mrf.mxu3 }
 0x256   :  { %v1758_v61 = vadd.f32 %v1728_v6, %v1608_v34  ;;  %v1461_v34 = vadd.f32 %v1437_v32, %v1310_v4  ;;  %v3509_v32 = vld [vmem:[%s5023_s5 + $0x40] sm:$0xff] }
 0x257   :  { %3383 = vmatmul.msk.f32.gmra.mxu3 %vm95_vm0, %v1843_v15 }
 0x258   :  { %3399 = vmatmul.msk.f32.gmra.mxu0 %vm95_vm0, %v1826_v16  ;;  %3432 = vmatmul.msk.f32.gmra.mxu2 %vm95_vm0, %v4590_v59  ;;  %v1778_v8 = vadd.f32 %v4428_v0, %v1758_v61  ;;  %v1611_v29 = vadd.f32 %v1587_v36, %v1461_v34 }
 0x259   :  { %3416 = vmatmul.msk.f32.gmra.mxu1 %vm95_vm0, %v2087_v50  ;;  %3043 = vmatpush.msra.mxu3 %v3509_v32 }
 0x25a   :  { %v1794_v9 = vmax.f32 %v1778_v8, 0.0  ;;  %v1311_v8 = vadd.f32 %v1289_v2, %v1161_v12  ;;  %v1440_v45 = vpop.f32.mrf.mxu0 }
 0x25b   :  { %v4604_v51 = vld [vmem:[#allocation3 + $0xb2] sm:$0xff] }
 0x25c   :  { %v1827_v5 = vld [vmem:[#allocation3 + $0xb1] sm:$0xff]  ;;  %1811 = vst.msk [vmem:[#allocation3 + $0xc2] sm:$0xff] %vm95_vm0, %v1794_v9  ;;  %v712_v9 = vadd.f32 %v4309_v58, %v4216_v62 }
 0x25d   :  { %v4606_v57 = vld [vmem:[#allocation3 + $0xb3] sm:$0xff]  ;;  %v1731_v49 = vpop.f32.mrf.mxu2  ;;  %v1292_v44 = vpop.f32.mrf.mxu3 }
 0x25e   :  { %v1759_v18 = vadd.f32 %v1731_v49, %v1609_v39  ;;  %v1462_v39 = vadd.f32 %v1440_v45, %v1311_v8  ;;  %v1312_v58 = vadd.f32 %v1292_v44, %v1162_v21 }
 0x25f   :  { %3384 = vmatmul.msk.f32.gmra.mxu3 %vm95_vm0, %v4604_v51 }
 0x260   :  { %3400 = vmatmul.msk.f32.gmra.mxu0 %vm95_vm0, %v1827_v5  ;;  %3433 = vmatmul.msk.f32.gmra.mxu2 %vm95_vm0, %v1827_v5  ;;  %v1779_v19 = vadd.f32 %v4428_v0, %v1759_v18  ;;  %v1590_v5 = vpop.f32.mrf.mxu1  ;;  %v863_v18 = vadd.f32 %v5047_v23, %v712_v9 }
 0x261   :  { %3417 = vmatmul.msk.f32.gmra.mxu1 %vm95_vm0, %v4606_v57  ;;  %v1612_v62 = vadd.f32 %v1590_v5, %v1462_v39 }
 0x262   :  { %v1795_v40 = vmax.f32 %v1779_v19, 0.0  ;;  %v1443_v46 = vpop.f32.mrf.mxu0 }
 0x263   :  { %v4621_v15 = vld [vmem:[#allocation3 + $0xc2] sm:$0xff] }
 0x264   :  { %v4623_v16 = vld [vmem:[#allocation3 + $0xc1] sm:$0xff]  ;;  %1812 = vst.msk [vmem:[#allocation3 + $0xd2] sm:$0xff] %vm95_vm0, %v1795_v40 }
 0x265   :  { %v4625_v30 = vld [vmem:[#allocation3 + $0xc3] sm:$0xff]  ;;  %v1734_v10 = vpop.f32.mrf.mxu2  ;;  %v1295_v12 = vpop.f32.mrf.mxu3 }
 0x266   :  { %v1760_v50 = vadd.f32 %v1734_v10, %v1610_v37  ;;  %v5048_v37 = vld [vmem:[#allocation11_spill] sm:$0xff]  ;;  %v1463_v10 = vadd.f32 %v1443_v46, %v1312_v58 }
 0x267   :  { %3385 = vmatmul.msk.f32.gmra.mxu3 %vm95_vm0, %v4621_v15  ;;  %v1013_v4 = vadd.f32 %v5048_v37, %v863_v18 }
 0x268   :  { %3401 = vmatmul.msk.f32.gmra.mxu0 %vm95_vm0, %v4623_v16  ;;  %3434 = vmatmul.msk.f32.gmra.mxu2 %vm95_vm0, %v4623_v16  ;;  %v1780_v6 = vadd.f32 %v4428_v0, %v1760_v50  ;;  %v1593_v2 = vpop.f32.mrf.mxu1 }
 0x269   :  { %3418 = vmatmul.msk.f32.gmra.mxu1 %vm95_vm0, %v4625_v30  ;;  %v1163_v13 = vadd.f32 %v5049_v53, %v1013_v4 }
 0x26a   :  { %v1796_v25 = vmax.f32 %v1780_v6, 0.0  ;;  %v1446_v45 = vpop.f32.mrf.mxu0 }
 0x26b   :  { %v4642_v61 = vld [vmem:[#allocation3 + $0xd2] sm:$0xff]  ;;  %v1313_v8 = vadd.f32 %v1295_v12, %v1163_v13 }
 0x26c   :  { %v4644_v47 = vld [vmem:[#allocation3 + $0xd1] sm:$0xff]  ;;  %1813 = vst.msk [vmem:[#allocation3 + $0xe2] sm:$0xff] %vm95_vm0, %v1796_v25 }
 0x26d   :  { %v4646_v43 = vld [vmem:[#allocation3 + $0xd3] sm:$0xff]  ;;  %v1737_v17 = vpop.f32.mrf.mxu2  ;;  %v1464_v56 = vadd.f32 %v1446_v45, %v1313_v8 }
 0x26e   :  { %v1761_v24 = vadd.f32 %v1737_v17, %v1611_v29  ;;  %v1613_v29 = vadd.f32 %v1593_v2, %v1463_v10  ;;  %v5052_v2 = vld [vmem:[#allocation16_spill] sm:$0xff] }
 0x26f   :  { %3386 = vmatmul.msk.f32.gmra.mxu3 %vm95_vm0, %v4642_v61 }
 0x270   :  { %3402 = vmatmul.msk.f32.gmra.mxu0 %vm95_vm0, %v4644_v47  ;;  %3435 = vmatmul.msk.f32.gmra.mxu2 %vm95_vm0, %v4644_v47  ;;  %v1781_v49 = vadd.f32 %v4428_v0, %v1761_v24  ;;  %v1596_v60 = vpop.f32.mrf.mxu1 }
 0x271   :  { %3419 = vmatmul.msk.f32.gmra.mxu1 %vm95_vm0, %v4646_v43  ;;  %v1614_v28 = vadd.f32 %v1596_v60, %v1464_v56  ;;  %v5055_v56 = vld [vmem:[#allocation19_spill] sm:$0xff] }
 0x272   :  { %v1797_v3 = vmax.f32 %v1781_v49, 0.0 }
 0x273   :  { %v4672_v20 = vld [vmem:[#allocation3 + $0xe2] sm:$0xff] }
 0x274   :  { %v4674_v35 = vld [vmem:[#allocation3 + $0xe1] sm:$0xff]  ;;  %1814 = vst.msk [vmem:[#allocation3 + $0xf2] sm:$0xff] %vm95_vm0, %v1797_v3 }
 0x275   :  { %v4676_v19 = vld [vmem:[#allocation3 + $0xe3] sm:$0xff]  ;;  %v1740_v40 = vpop.f32.mrf.mxu2 }
 0x276   :  { %v1762_v36 = vadd.f32 %v1740_v40, %v1612_v62  ;;  %v5050_v40 = vld [vmem:[#allocation14_spill] sm:$0xff]  ;;  %v4754_v32 = vpop.f32.mrf.mxu3 }
 0x277   :  { %3387 = vmatmul.msk.f32.gmra.mxu3 %vm95_vm0, %v4672_v20 }
 0x278   :  { %3403 = vmatmul.msk.f32.gmra.mxu0 %vm95_vm0, %v4674_v35  ;;  %3436 = vmatmul.msk.f32.gmra.mxu2 %vm95_vm0, %v4674_v35  ;;  %v1782_v50 = vadd.f32 %v4428_v0, %v1762_v36  ;;  %v4742_v58 = vpop.f32.mrf.mxu1  ;;  %v5051_v36 = vld [vmem:[#allocation15_spill] sm:$0xff] }
 0x279   :  { %3420 = vmatmul.msk.f32.gmra.mxu1 %vm95_vm0, %v4676_v19 }
 0x27a   :  { %v1798_v34 = vmax.f32 %v1782_v50, 0.0 }
 0x27b   :  { %v4693_v6 = vld [vmem:[#allocation3 + $0xf2] sm:$0xff] }
 0x27c   :  { %v4695_v54 = vld [vmem:[#allocation3 + $0xf1] sm:$0xff]  ;;  %1815 = vst.msk [vmem:[#allocation3 + $0x102] sm:$0xff] %vm95_vm0, %v1798_v34  ;;  %v5053_v34 = vld [vmem:[#allocation18_spill] sm:$0xff] }
 0x27d   :  { %v4697_v25 = vld [vmem:[#allocation3 + $0xf3] sm:$0xff]  ;;  %v1743_v17 = vpop.f32.mrf.mxu2 }
 0x27e   :  { %v1763_v1 = vadd.f32 %v1743_v17, %v1613_v29 }
 0x27f   :  { %3388 = vmatmul.msk.f32.gmra.mxu3 %vm95_vm0, %v4693_v6 }
 0x280   :  { %3404 = vmatmul.msk.f32.gmra.mxu0 %vm95_vm0, %v4695_v54  ;;  %3437 = vmatmul.msk.f32.gmra.mxu2 %vm95_vm0, %v4695_v54  ;;  %v1783_v42 = vadd.f32 %v4428_v0, %v1763_v1  ;;  %v5054_v1 = vld [vmem:[#allocation17_spill] sm:$0xff] }
 0x281   :  { %3421 = vmatmul.msk.f32.gmra.mxu1 %vm95_vm0, %v4697_v25 }
 0x282   :  { %v1799_v9 = vmax.f32 %v1783_v42, 0.0 }
 0x283   :  { %v4709_v24 = vld [vmem:[#allocation3 + $0x102] sm:$0xff] }
 0x284   :  { %v4711_v5 = vld [vmem:[#allocation3 + $0x101] sm:$0xff]  ;;  %1816 = vst.msk [vmem:[#allocation3 + $0x112] sm:$0xff] %vm95_vm0, %v1799_v9 }
 0x285   :  { %v4713_v39 = vld [vmem:[#allocation3 + $0x103] sm:$0xff]  ;;  %v1746_v21 = vpop.f32.mrf.mxu2 }
 0x286   :  { %v1764_v49 = vadd.f32 %v1746_v21, %v1614_v28 }
 0x287   :  { %3389 = vmatmul.msk.f32.gmra.mxu3 %vm95_vm0, %v4709_v24 }
 0x288   :  { %3405 = vmatmul.msk.f32.gmra.mxu0 %vm95_vm0, %v4711_v5  ;;  %3438 = vmatmul.msk.f32.gmra.mxu2 %vm95_vm0, %v4711_v5  ;;  %v1784_v44 = vadd.f32 %v4428_v0, %v1764_v49  ;;  %v4740_v0 = vpop.f32.mrf.mxu0 }
 0x289   :  { %3422 = vmatmul.msk.f32.gmra.mxu1 %vm95_vm0, %v4713_v39 }
 0x28a   :  { %v1800_v23 = vmax.f32 %v1784_v44, 0.0 }
 0x28b   :  { %v4725_v18 = vld [vmem:[#allocation3 + $0x112] sm:$0xff] }
 0x28c   :  { %v4727_v3 = vld [vmem:[#allocation3 + $0x111] sm:$0xff]  ;;  %1817 = vst.msk [vmem:[#allocation3 + $0x122] sm:$0xff] %vm95_vm0, %v1800_v23 }
 0x28d   :  { %v4729_v62 = vld [vmem:[#allocation3 + $0x113] sm:$0xff] }
 0x28f   :  { %3390 = vmatmul.msk.f32.gmra.mxu3 %vm95_vm0, %v4725_v18 }
 0x290   :  { %3406 = vmatmul.msk.f32.gmra.mxu0 %vm95_vm0, %v4727_v3  ;;  %3439 = vmatmul.msk.f32.gmra.mxu2 %vm95_vm0, %v4727_v3 }
 0x291   :  { %3423 = vmatmul.msk.f32.gmra.mxu1 %vm95_vm0, %v4729_v62 }
 0x293   :  { %v4744_v46 = vld [vmem:[#allocation3 + $0x121] sm:$0xff] }
 0x297   :  { %3442 = vmatmul.msk.f32.vlgmr.msrb.gmra.mxu3 %vm95_vm0, %v5050_v40 }
 0x298   :  { %3459 = vmatmul.msk.f32.vlgmr.msra.gmra.mxu0 %vm95_vm0, %v4461_v38  ;;  %3440 = vmatmul.msk.f32.gmra.mxu2 %vm95_vm0, %v4744_v46 }
 0x299   :  { %3476 = vmatmul.msk.f32.vlgmr.msra.gmra.mxu1 %vm95_vm0, %v4474_v22 }
 0x29a   :  { %v2034_v37 = vpop.f32.mrf.mxu0 }
 0x29b   :  { %v2165_v4 = vpop.f32.mrf.mxu1 }
 0x29f   :  { %3443 = vmatmul.msk.f32.gmra.mxu3 %vm95_vm0, %v4472_v63  ;;  %v1921_v38 = vpop.f32.mrf.mxu3 }
 0x2a0   :  { %3460 = vmatmul.msk.f32.gmra.mxu0 %vm95_vm0, %v5051_v36  ;;  %3493 = vmatmul.msk.f32.vlgmr.msra.gmra.mxu2 %vm95_vm0, %v4472_v63  ;;  %v2035_v10 = vadd.f32 %v2034_v37, %v1921_v38  ;;  %v4764_v53 = vpop.f32.mrf.mxu2 }
 0x2a1   :  { %3477 = vmatmul.msk.f32.gmra.mxu1 %vm95_vm0, %v4491_v27 }
 0x2a2   :  { %v2211_v50 = vadd.f32 %v2165_v4, %v2035_v10 }
 0x2a3   :  { %v2037_v22 = vpop.f32.mrf.mxu0 }
 0x2a4   :  { %v2168_v13 = vpop.f32.mrf.mxu1 }
 0x2a7   :  { %3444 = vmatmul.msk.f32.gmra.mxu3 %vm95_vm0, %v4489_v48 }
 0x2a8   :  { %3461 = vmatmul.msk.f32.gmra.mxu0 %vm95_vm0, %v5052_v2  ;;  %3494 = vmatmul.msk.f32.gmra.mxu2 %vm95_vm0, %v4489_v48  ;;  %v1924_v63 = vpop.f32.mrf.mxu3 }
 0x2a9   :  { %3478 = vmatmul.msk.f32.gmra.mxu1 %vm95_vm0, %v5053_v34  ;;  %v2038_v27 = vadd.f32 %v2037_v22, %v1924_v63  ;;  %v2312_v12 = vpop.f32.mrf.mxu2 }
 0x2aa   :  { %v4774_v29 = vadd.f32 %v2312_v12, %v2211_v50 }
 0x2ab   :  { %v2040_v8 = vpop.f32.mrf.mxu0  ;;  %v2212_v17 = vadd.f32 %v2168_v13, %v2038_v27 }
 0x2ac   :  { %v2171_v45 = vpop.f32.mrf.mxu1 }
 0x2af   :  { %3445 = vmatmul.msk.f32.gmra.mxu3 %vm95_vm0, %v5054_v1 }
 0x2b0   :  { %3462 = vmatmul.msk.f32.gmra.mxu0 %vm95_vm0, %v5055_v56  ;;  %3495 = vmatmul.msk.f32.gmra.mxu2 %vm95_vm0, %v5054_v1  ;;  %v1927_v48 = vpop.f32.mrf.mxu3  ;;  %v2380_v1 = vld [vmem:[#allocation3 + $0x82] sm:$0xff] }
 0x2b1   :  { %3479 = vmatmul.msk.f32.gmra.mxu1 %vm95_vm0, %v4528_v55  ;;  %v2041_v42 = vadd.f32 %v2040_v8, %v1927_v48  ;;  %v2315_v60 = vpop.f32.mrf.mxu2  ;;  %v4816_v48 = vld [vmem:[#allocation3 + $0x83] sm:$0xff] }
 0x2b2   :  { %v4784_v9 = vadd.f32 %v2315_v60, %v2212_v17 }
 0x2b3   :  { %v2043_v28 = vpop.f32.mrf.mxu0  ;;  %v2213_v49 = vadd.f32 %v2171_v45, %v2041_v42  ;;  %v2675_v45 = vld [vmem:[#allocation3 + $0x91] sm:$0xff] }
 0x2b4   :  { %v2174_v21 = vpop.f32.mrf.mxu1 }
 0x2b7   :  { %3446 = vmatmul.msk.f32.gmra.mxu3 %vm95_vm0, %v4526_v14 }
 0x2b8   :  { %3463 = vmatmul.msk.f32.gmra.mxu0 %vm95_vm0, %v4530_v41  ;;  %3496 = vmatmul.msk.f32.gmra.mxu2 %vm95_vm0, %v4526_v14  ;;  %v1930_v55 = vpop.f32.mrf.mxu3 }
 0x2b9   :  { %3480 = vmatmul.msk.f32.gmra.mxu1 %vm95_vm0, %v4550_v11  ;;  %v2044_v44 = vadd.f32 %v2043_v28, %v1930_v55  ;;  %v2318_v23 = vpop.f32.mrf.mxu2 }
 0x2ba   :  { %v4794_v40 = vadd.f32 %v2318_v23, %v2213_v49  ;;  %v2822_v49 = vld [vmem:[#allocation3 + $0x92] sm:$0xff] }
 0x2bb   :  { %v2214_v38 = vadd.f32 %v2174_v21, %v2044_v44 }
 0x2bd   :  { %v2046_v37 = vpop.f32.mrf.mxu0 }
 0x2be   :  { %v2177_v4 = vpop.f32.mrf.mxu1 }
 0x2bf   :  { %3447 = vmatmul.msk.f32.gmra.mxu3 %vm95_vm0, %v4548_v33 }
 0x2c0   :  { %3464 = vmatmul.msk.f32.gmra.mxu0 %vm95_vm0, %v4552_v31  ;;  %3497 = vmatmul.msk.f32.gmra.mxu2 %vm95_vm0, %v4548_v33 }
 0x2c1   :  { %3481 = vmatmul.msk.f32.gmra.mxu1 %vm95_vm0, %v4571_v7 }
 0x2c2   :  { %v1933_v14 = vpop.f32.mrf.mxu3 }
 0x2c3   :  { %v2047_v11 = vadd.f32 %v2046_v37, %v1933_v14  ;;  %v2321_v10 = vpop.f32.mrf.mxu2 }
 0x2c4   :  { %v4804_v22 = vadd.f32 %v2321_v10, %v2214_v38 }
 0x2c5   :  { %v2049_v13 = vpop.f32.mrf.mxu0  ;;  %v2215_v34 = vadd.f32 %v2177_v4, %v2047_v11 }
 0x2c6   :  { %v2180_v50 = vpop.f32.mrf.mxu1 }
 0x2c7   :  { %3448 = vmatmul.msk.f32.gmra.mxu3 %vm95_vm0, %v4569_v52 }
 0x2c8   :  { %3465 = vmatmul.msk.f32.gmra.mxu0 %vm95_vm0, %v4573_v26  ;;  %3498 = vmatmul.msk.f32.gmra.mxu2 %vm95_vm0, %v4569_v52 }
 0x2c9   :  { %3482 = vmatmul.msk.f32.gmra.mxu1 %vm95_vm0, %v4590_v59 }
 0x2ca   :  { %v1936_v33 = vpop.f32.mrf.mxu3 }
 0x2cb   :  { %v2050_v7 = vadd.f32 %v2049_v13, %v1936_v33  ;;  %v2324_v63 = vpop.f32.mrf.mxu2 }
 0x2cc   :  { %v4814_v27 = vadd.f32 %v2324_v63, %v2215_v34 }
 0x2cd   :  { %v2052_v12 = vpop.f32.mrf.mxu0  ;;  %v2216_v17 = vadd.f32 %v2180_v50, %v2050_v7 }
 0x2ce   :  { %v2183_v8 = vpop.f32.mrf.mxu1 }
 0x2cf   :  { %3449 = vmatmul.msk.f32.gmra.mxu3 %vm95_vm0, %v2380_v1 }
 0x2d0   :  { %3466 = vmatmul.msk.f32.gmra.mxu0 %vm95_vm0, %v4816_v48  ;;  %3499 = vmatmul.msk.f32.gmra.mxu2 %vm95_vm0, %v2380_v1 }
 0x2d1   :  { %3483 = vmatmul.msk.f32.gmra.mxu1 %vm95_vm0, %v2675_v45 }
 0x2d2   :  { %v1939_v52 = vpop.f32.mrf.mxu3 }
 0x2d3   :  { %v2053_v59 = vadd.f32 %v2052_v12, %v1939_v52  ;;  %v2327_v42 = vpop.f32.mrf.mxu2 }
 0x2d4   :  { %v4823_v60 = vadd.f32 %v2327_v42, %v2216_v17 }
 0x2d5   :  { %v2055_v28 = vpop.f32.mrf.mxu0  ;;  %v2217_v55 = vadd.f32 %v2183_v8, %v2053_v59 }
 0x2d6   :  { %v2186_v21 = vpop.f32.mrf.mxu1 }
 0x2d7   :  { %3450 = vmatmul.msk.f32.gmra.mxu3 %vm95_vm0, %v4604_v51 }
 0x2d8   :  { %3467 = vmatmul.msk.f32.gmra.mxu0 %vm95_vm0, %v4606_v57  ;;  %3500 = vmatmul.msk.f32.gmra.mxu2 %vm95_vm0, %v2822_v49 }
 0x2d9   :  { %3484 = vmatmul.msk.f32.gmra.mxu1 %vm95_vm0, %v4623_v16 }
 0x2da   :  { %v1942_v44 = vpop.f32.mrf.mxu3 }
 0x2db   :  { %v2056_v23 = vadd.f32 %v2055_v28, %v1942_v44  ;;  %v2330_v37 = vpop.f32.mrf.mxu2 }
 0x2dc   :  { %v4832_v4 = vadd.f32 %v2330_v37, %v2217_v55 }
 0x2dd   :  { %v2058_v38 = vpop.f32.mrf.mxu0  ;;  %v2218_v11 = vadd.f32 %v2186_v21, %v2056_v23 }
 0x2de   :  { %v2189_v14 = vpop.f32.mrf.mxu1 }
 0x2df   :  { %3451 = vmatmul.msk.f32.gmra.mxu3 %vm95_vm0, %v4621_v15 }
 0x2e0   :  { %3468 = vmatmul.msk.f32.gmra.mxu0 %vm95_vm0, %v4625_v30  ;;  %3501 = vmatmul.msk.f32.gmra.mxu2 %vm95_vm0, %v4621_v15 }
 0x2e1   :  { %3485 = vmatmul.msk.f32.gmra.mxu1 %vm95_vm0, %v4644_v47 }
 0x2e2   :  { %v1945_v51 = vpop.f32.mrf.mxu3 }
 0x2e3   :  { %v2059_v57 = vadd.f32 %v2058_v38, %v1945_v51  ;;  %v2333_v16 = vpop.f32.mrf.mxu2 }
 0x2e4   :  { %v4842_v10 = vadd.f32 %v2333_v16, %v2218_v11  ;;  %v2683_v16 = vld [vmem:[#allocation3 + $0x131] sm:$0xff] }
 0x2e5   :  { %v2061_v13 = vpop.f32.mrf.mxu0  ;;  %v2219_v34 = vadd.f32 %v2189_v14, %v2059_v57 }
 0x2e6   :  { %v2192_v50 = vpop.f32.mrf.mxu1 }
 0x2e7   :  { %3452 = vmatmul.msk.f32.gmra.mxu3 %vm95_vm0, %v4642_v61 }
 0x2e8   :  { %3469 = vmatmul.msk.f32.gmra.mxu0 %vm95_vm0, %v4646_v43  ;;  %3502 = vmatmul.msk.f32.gmra.mxu2 %vm95_vm0, %v4642_v61 }
 0x2e9   :  { %3486 = vmatmul.msk.f32.gmra.mxu1 %vm95_vm0, %v4674_v35 }
 0x2ea   :  { %v1948_v15 = vpop.f32.mrf.mxu3 }
 0x2eb   :  { %v2062_v47 = vadd.f32 %v2061_v13, %v1948_v15  ;;  %v2336_v33 = vpop.f32.mrf.mxu2  ;;  %v2388_v13 = vld [vmem:[#allocation3 + $0x122] sm:$0xff] }
 0x2ec   :  { %v4852_v7 = vadd.f32 %v2336_v33, %v2219_v34  ;;  %v2032_v34 = vadd.f32 %v4740_v0, %v4754_v32 }
 0x2ed   :  { %v2064_v63 = vpop.f32.mrf.mxu0  ;;  %v2220_v8 = vadd.f32 %v2192_v50, %v2062_v47  ;;  %v4894_v50 = vld [vmem:[#allocation3 + $0x123] sm:$0xff] }
 0x2ee   :  { %v2195_v12 = vpop.f32.mrf.mxu1 }
 0x2ef   :  { %3453 = vmatmul.msk.f32.gmra.mxu3 %vm95_vm0, %v4672_v20 }
 0x2f0   :  { %3470 = vmatmul.msk.f32.gmra.mxu0 %vm95_vm0, %v4676_v19  ;;  %3503 = vmatmul.msk.f32.gmra.mxu2 %vm95_vm0, %v4672_v20 }
 0x2f1   :  { %3487 = vmatmul.msk.f32.gmra.mxu1 %vm95_vm0, %v4695_v54 }
 0x2f2   :  { %v1951_v61 = vpop.f32.mrf.mxu3 }
 0x2f3   :  { %v2065_v35 = vadd.f32 %v2064_v63, %v1951_v61  ;;  %v2339_v45 = vpop.f32.mrf.mxu2  ;;  %v2210_v61 = vadd.f32 %v4742_v58, %v2032_v34 }
 0x2f4   :  { %v4862_v17 = vadd.f32 %v2339_v45, %v2220_v8 }
 0x2f5   :  { %v2067_v1 = vpop.f32.mrf.mxu0  ;;  %v2221_v52 = vadd.f32 %v2195_v12, %v2065_v35  ;;  %v2830_v12 = vld [vmem:[#allocation3 + $0x132] sm:$0xff]  ;;  %v2357_v35 = vadd.f32 %v4764_v53, %v2210_v61 }
 0x2f6   :  { %v2198_v59 = vpop.f32.mrf.mxu1 }
 0x2f7   :  { %3454 = vmatmul.msk.f32.gmra.mxu3 %vm95_vm0, %v4693_v6 }
 0x2f8   :  { %3471 = vmatmul.msk.f32.gmra.mxu0 %vm95_vm0, %v4697_v25  ;;  %3504 = vmatmul.msk.f32.gmra.mxu2 %vm95_vm0, %v4693_v6 }
 0x2f9   :  { %3488 = vmatmul.msk.f32.gmra.mxu1 %vm95_vm0, %v4711_v5 }
 0x2fa   :  { %v1954_v20 = vpop.f32.mrf.mxu3 }
 0x2fb   :  { %v2068_v54 = vadd.f32 %v2067_v1, %v1954_v20  ;;  %v2342_v42 = vpop.f32.mrf.mxu2 }
 0x2fc   :  { %v4872_v28 = vadd.f32 %v2342_v42, %v2221_v52 }
 0x2fd   :  { %v2222_v21 = vadd.f32 %v2198_v59, %v2068_v54  ;;  %v2070_v49 = vpop.f32.mrf.mxu0  ;;  %v2969_v54 = vld [vmem:[#allocation3 + $0x93] sm:$0xff] }
 0x2fe   :  { %v2201_v55 = vpop.f32.mrf.mxu1 }
 0x2ff   :  { %3455 = vmatmul.msk.f32.gmra.mxu3 %vm95_vm0, %v4709_v24 }
 0x300   :  { %3472 = vmatmul.msk.f32.gmra.mxu0 %vm95_vm0, %v4713_v39  ;;  %3505 = vmatmul.msk.f32.gmra.mxu2 %vm95_vm0, %v4709_v24 }
 0x301   :  { %3489 = vmatmul.msk.f32.gmra.mxu1 %vm95_vm0, %v4727_v3 }
 0x302   :  { %v1957_v6 = vpop.f32.mrf.mxu3 }
 0x303   :  { %v2071_v5 = vadd.f32 %v2070_v49, %v1957_v6  ;;  %v2345_v44 = vpop.f32.mrf.mxu2 }
 0x304   :  { %v4882_v23 = vadd.f32 %v2345_v44, %v2222_v21 }
 0x305   :  { %v2223_v37 = vadd.f32 %v2201_v55, %v2071_v5  ;;  %v2073_v38 = vpop.f32.mrf.mxu0 }
 0x306   :  { %v2204_v24 = vpop.f32.mrf.mxu1 }
 0x307   :  { %3456 = vmatmul.msk.f32.gmra.mxu3 %vm95_vm0, %v4725_v18 }
 0x308   :  { %3473 = vmatmul.msk.f32.gmra.mxu0 %vm95_vm0, %v4729_v62  ;;  %3506 = vmatmul.msk.f32.gmra.mxu2 %vm95_vm0, %v4725_v18 }
 0x309   :  { %3490 = vmatmul.msk.f32.gmra.mxu1 %vm95_vm0, %v4744_v46 }
 0x30a   :  { %v1960_v3 = vpop.f32.mrf.mxu3 }
 0x30b   :  { %v2074_v14 = vadd.f32 %v2073_v38, %v1960_v3  ;;  %v2348_v11 = vpop.f32.mrf.mxu2  ;;  %v2977_v38 = vld [vmem:[#allocation3 + $0x133] sm:$0xff] }
 0x30c   :  { %v4892_v51 = vadd.f32 %v2348_v11, %v2223_v37 }
 0x30d   :  { %v2224_v57 = vadd.f32 %v2204_v24, %v2074_v14  ;;  %v2076_v18 = vpop.f32.mrf.mxu0 }
 0x30e   :  { %v2207_v33 = vpop.f32.mrf.mxu1 }
 0x30f   :  { %3457 = vmatmul.msk.f32.gmra.mxu3 %vm95_vm0, %v2388_v13 }
 0x310   :  { %3474 = vmatmul.msk.f32.gmra.mxu0 %vm95_vm0, %v4894_v50  ;;  %3507 = vmatmul.msk.f32.gmra.mxu2 %vm95_vm0, %v2388_v13  ;;  %v4980_v13 = vld [vmem:[%s5024_s6] ss:$0 sm:$0xff]  ;;  %s3590_s6 = smov [#allocation7]  }
 0x311   :  { %3491 = vmatmul.msk.f32.gmra.mxu1 %vm95_vm0, %v2683_v16  ;;  %s3165_s24 = sshll.u32 %s3590_s6, 4  ;;  %s3166_s24 = int_to_ptr.vmem [resolvable:$true] %s3165_s24 }
 0x312   :  { %v1963_v46 = vpop.f32.mrf.mxu3 }
 0x313   :  { %v2077_v15 = vadd.f32 %v2076_v18, %v1963_v46  ;;  %v2351_v47 = vpop.f32.mrf.mxu2 }
 0x314   :  { %v2371_v63 = vadd.f32 %v2351_v47, %v2224_v57 }
 0x315   :  { %v2225_v8 = vadd.f32 %v2207_v33, %v2077_v15  ;;  %v2603_v21 = vpop.f32.mrf.mxu0 }
 0x317   :  { %3510 = vmatmul.msk.f32.vlgmr.msra.gmra.mxu3 %vm95_vm0, %v5051_v36 }
 0x318   :  { %3508 = vmatmul.msk.f32.gmra.mxu2 %vm95_vm0, %v2830_v12 }
 0x31a   :  { %v2456_v45 = vpop.f32.mrf.mxu3 }
 0x31b   :  { %v2354_v1 = vpop.f32.mrf.mxu2  ;;  %v2504_v52 = vadd.f32 %v2456_v45, %v2357_v35 }
 0x31c   :  { %v2372_v59 = vadd.f32 %v2354_v1, %v2225_v8 }
 0x31d   :  { %v2606_v55 = vpop.f32.mrf.mxu0  ;;  %v2651_v3 = vadd.f32 %v2603_v21, %v2504_v52 }
 0x31f   :  { %3511 = vmatmul.msk.f32.gmra.mxu3 %vm95_vm0, %v5052_v2 }
 0x322   :  { %v2459_v0 = vpop.f32.mrf.mxu3 }
 0x323   :  { %v2505_v32 = vadd.f32 %v2459_v0, %v4774_v29 }
 0x325   :  { %v2609_v5 = vpop.f32.mrf.mxu0  ;;  %v2652_v18 = vadd.f32 %v2606_v55, %v2505_v32 }
 0x327   :  { %3512 = vmatmul.msk.f32.gmra.mxu3 %vm95_vm0, %v5055_v56 }
 0x32a   :  { %v2462_v58 = vpop.f32.mrf.mxu3 }
 0x32b   :  { %v4914_v36 = vadd.f32 %v2462_v58, %v4784_v9 }
 0x32d   :  { %v2612_v24 = vpop.f32.mrf.mxu0  ;;  %v2653_v35 = vadd.f32 %v2609_v5, %v4914_v36 }
 0x32f   :  { %3513 = vmatmul.msk.f32.gmra.mxu3 %vm95_vm0, %v4530_v41 }
 0x332   :  { %v2465_v53 = vpop.f32.mrf.mxu3 }
 0x333   :  { %v4919_v20 = vadd.f32 %v2465_v53, %v4794_v40 }
 0x335   :  { %v2615_v34 = vpop.f32.mrf.mxu0 }
 0x337   :  { %3514 = vmatmul.msk.f32.gmra.mxu3 %vm95_vm0, %v4552_v31 }
 0x33a   :  { %v2468_v2 = vpop.f32.mrf.mxu3 }
 0x33b   :  { %v4924_v29 = vadd.f32 %v2468_v2, %v4804_v22 }
 0x33d   :  { %v2618_v52 = vpop.f32.mrf.mxu0 }
 0x33f   :  { %3515 = vmatmul.msk.f32.gmra.mxu3 %vm95_vm0, %v4573_v26 }
 0x342   :  { %v2471_v56 = vpop.f32.mrf.mxu3 }
 0x343   :  { %v4929_v9 = vadd.f32 %v2471_v56, %v4814_v27  ;;  %v2654_v56 = vadd.f32 %v2612_v24, %v4919_v20 }
 0x345   :  { %v2656_v5 = vadd.f32 %v2618_v52, %v4929_v9 }
 0x347   :  { %3516 = vmatmul.msk.f32.gmra.mxu3 %vm95_vm0, %v4816_v48 }
 0x34a   :  { %v2474_v41 = vpop.f32.mrf.mxu3 }
 0x34b   :  { %v4934_v40 = vadd.f32 %v2474_v41, %v4823_v60 }
 0x34f   :  { %3517 = vmatmul.msk.f32.gmra.mxu3 %vm95_vm0, %v2969_v54 }
 0x352   :  { %v2477_v31 = vpop.f32.mrf.mxu3 }
 0x353   :  { %v4938_v22 = vadd.f32 %v2477_v31, %v4832_v4 }
 0x357   :  { %3518 = vmatmul.msk.f32.gmra.mxu3 %vm95_vm0, %v4625_v30 }
 0x35a   :  { %v2480_v26 = vpop.f32.mrf.mxu3 }
 0x35b   :  { %v4943_v27 = vadd.f32 %v2480_v26, %v4842_v10 }
 0x35f   :  { %3519 = vmatmul.msk.f32.gmra.mxu3 %vm95_vm0, %v4646_v43  ;;  %v2751_v43 = vpop.f32.mrf.mxu1 }
 0x360   :  { %v2799_v57 = vadd.f32 %v2751_v43, %v2651_v3 }
 0x362   :  { %v2483_v48 = vpop.f32.mrf.mxu3 }
 0x363   :  { %v4948_v60 = vadd.f32 %v2483_v48, %v4852_v7  ;;  %v2898_v7 = vpop.f32.mrf.mxu2  ;;  %v2621_v48 = vpop.f32.mrf.mxu0 }
 0x364   :  { %v2946_v16 = vadd.f32 %v2898_v7, %v2799_v57 }
 0x367   :  { %3520 = vmatmul.msk.f32.gmra.mxu3 %vm95_vm0, %v4676_v19 }
 0x36a   :  { %v2486_v42 = vpop.f32.mrf.mxu3 }
 0x36b   :  { %v4953_v4 = vadd.f32 %v2486_v42, %v4862_v17  ;;  %v2754_v17 = vpop.f32.mrf.mxu1  ;;  %v2624_v20 = vpop.f32.mrf.mxu0 }
 0x36c   :  { %v2800_v47 = vadd.f32 %v2754_v17, %v2652_v18 }
 0x36f   :  { %3521 = vmatmul.msk.f32.gmra.mxu3 %vm95_vm0, %v4697_v25  ;;  %v2901_v25 = vpop.f32.mrf.mxu2 }
 0x370   :  { %v2947_v8 = vadd.f32 %v2901_v25, %v2800_v47  ;;  %v2658_v47 = vadd.f32 %v2624_v20, %v4938_v22 }
 0x372   :  { %v2489_v30 = vpop.f32.mrf.mxu3 }
 0x373   :  { %v4958_v10 = vadd.f32 %v2489_v30, %v4872_v28  ;;  %v2757_v44 = vpop.f32.mrf.mxu1  ;;  %v2655_v30 = vadd.f32 %v2615_v34, %v4924_v29  ;;  %v2627_v57 = vpop.f32.mrf.mxu0 }
 0x374   :  { %v2659_v52 = vadd.f32 %v2627_v57, %v4943_v27 }
 0x377   :  { %3522 = vmatmul.msk.f32.gmra.mxu3 %vm95_vm0, %v4713_v39 }
 0x37a   :  { %v2492_v49 = vpop.f32.mrf.mxu3 }
 0x37b   :  { %v4963_v19 = vadd.f32 %v2492_v49, %v4882_v23  ;;  %v2904_v23 = vpop.f32.mrf.mxu2  ;;  %v2760_v11 = vpop.f32.mrf.mxu1 }
 0x37c   :  { %v2802_v31 = vadd.f32 %v2760_v11, %v2654_v56  ;;  %v2657_v11 = vadd.f32 %v2621_v48, %v4934_v40 }
 0x37f   :  { %3523 = vmatmul.msk.f32.gmra.mxu3 %vm95_vm0, %v4729_v62 }
 0x382   :  { %v2495_v6 = vpop.f32.mrf.mxu3 }
 0x383   :  { %v4968_v28 = vadd.f32 %v2495_v6, %v4892_v51  ;;  %v2907_v51 = vpop.f32.mrf.mxu2  ;;  %v2763_v33 = vpop.f32.mrf.mxu1 }
 0x384   :  { %v2949_v36 = vadd.f32 %v2907_v51, %v2802_v31  ;;  %v2803_v55 = vadd.f32 %v2763_v33, %v2655_v30 }
 0x387   :  { %3524 = vmatmul.msk.f32.gmra.mxu3 %vm95_vm0, %v4894_v50 }
 0x38a   :  { %v2498_v39 = vpop.f32.mrf.mxu3 }
 0x38b   :  { %v4972_v37 = vadd.f32 %v2498_v39, %v2371_v63  ;;  %v2910_v12 = vpop.f32.mrf.mxu2  ;;  %v2766_v58 = vpop.f32.mrf.mxu1 }
 0x38c   :  { %v2950_v25 = vadd.f32 %v2910_v12, %v2803_v55  ;;  %v2804_v24 = vadd.f32 %v2766_v58, %v2656_v5  ;;  %v2630_v12 = vpop.f32.mrf.mxu0 }
 0x38d   :  { %v2660_v56 = vadd.f32 %v2630_v12, %v4948_v60 }
 0x38f   :  { %3525 = vmatmul.msk.f32.gmra.mxu3 %vm95_vm0, %v2977_v38 }
 0x392   :  { %v2501_v62 = vpop.f32.mrf.mxu3 }
 0x393   :  { %v4975_v14 = vadd.f32 %v2501_v62, %v2372_v59  ;;  %v2801_v59 = vadd.f32 %v2757_v44, %v2653_v35  ;;  %v2913_v53 = vpop.f32.mrf.mxu2  ;;  %v2769_v21 = vpop.f32.mrf.mxu1 }
 0x394   :  { %v2951_v62 = vadd.f32 %v2913_v53, %v2804_v24  ;;  %v2633_v53 = vpop.f32.mrf.mxu0 }
 0x395   :  { %v2948_v32 = vadd.f32 %v2904_v23, %v2801_v59 }
 0x39a   :  { %v3045_v50 = vpop.f32.mrf.mxu3 }
 0x39b   :  { %v3093_v46 = vadd.f32 %v3045_v50, %v2946_v16  ;;  %v2916_v7 = vpop.f32.mrf.mxu2  ;;  %v2772_v44 = vpop.f32.mrf.mxu1  ;;  %v2805_v50 = vadd.f32 %v2769_v21, %v2657_v11  ;;  %v2661_v21 = vadd.f32 %v2633_v53, %v4953_v4 }
 0x39c   :  { %v2636_v27 = vpop.f32.mrf.mxu0 }
 0x39d   :  { %v3113_v15 = vadd.f32 %v4980_v13, %v3093_v46  ;;  %v2952_v34 = vadd.f32 %v2916_v7, %v2805_v50 }
 0x39f   :  { %v3129_v63 = vmax.f32 %v3113_v15, 0.0 }
 0x3a1   :  { %3145 = vst [vmem:[#allocation7] sm:$0xff] %v3129_v63 }
 0x3a2   :  { %v3048_v61 = vpop.f32.mrf.mxu3 }
 0x3a3   :  { %v3094_v45 = vadd.f32 %v3048_v61, %v2947_v8  ;;  %v2919_v38 = vpop.f32.mrf.mxu2  ;;  %v2775_v18 = vpop.f32.mrf.mxu1  ;;  %v2806_v8 = vadd.f32 %v2772_v44, %v2658_v47 }
 0x3a5   :  { %v3114_v1 = vadd.f32 %v4980_v13, %v3094_v45  ;;  %v2953_v40 = vadd.f32 %v2919_v38, %v2806_v8 }
 0x3a7   :  { %v3130_v0 = vmax.f32 %v3114_v1, 0.0 }
 0x3a9   :  { %3146 = vst [vmem:[#allocation7 + $0x8] sm:$0xff] %v3130_v0 }
 0x3aa   :  { %v3051_v2 = vpop.f32.mrf.mxu3 }
 0x3ab   :  { %v3095_v41 = vadd.f32 %v3051_v2, %v2948_v32  ;;  %v2922_v9 = vpop.f32.mrf.mxu2  ;;  %v2778_v35 = vpop.f32.mrf.mxu1  ;;  %v2807_v32 = vadd.f32 %v2775_v18, %v2659_v52 }
 0x3ac   :  { %v2808_v48 = vadd.f32 %v2778_v35, %v2660_v56 }
 0x3ad   :  { %v3115_v54 = vadd.f32 %v4980_v13, %v3095_v41  ;;  %v2954_v22 = vadd.f32 %v2922_v9, %v2807_v32 }
 0x3af   :  { %v3131_v26 = vmax.f32 %v3115_v54, 0.0 }
 0x3b1   :  { %3147 = vst [vmem:[#allocation7 + $0x10] sm:$0xff] %v3131_v26 }
 0x3b2   :  { %v3054_v42 = vpop.f32.mrf.mxu3 }
 0x3b3   :  { %v3096_v43 = vadd.f32 %v3054_v42, %v2949_v36  ;;  %v2925_v45 = vpop.f32.mrf.mxu2  ;;  %v2781_v41 = vpop.f32.mrf.mxu1 }
 0x3b4   :  { %v2955_v42 = vadd.f32 %v2925_v45, %v2808_v48 }
 0x3b5   :  { %v3116_v49 = vadd.f32 %v4980_v13, %v3096_v43 }
 0x3b7   :  { %v3132_v17 = vmax.f32 %v3116_v49, 0.0 }
 0x3b9   :  { %3148 = vst [vmem:[#allocation7 + $0x18] sm:$0xff] %v3132_v17  ;;  %v2809_v17 = vadd.f32 %v2781_v41, %v2661_v21 }
 0x3ba   :  { %v3057_v6 = vpop.f32.mrf.mxu3 }
 0x3bb   :  { %v3097_v39 = vadd.f32 %v3057_v6, %v2950_v25  ;;  %v2928_v31 = vpop.f32.mrf.mxu2  ;;  %v2784_v7 = vpop.f32.mrf.mxu1  ;;  %v2662_v6 = vadd.f32 %v2636_v27, %v4958_v10 }
 0x3bc   :  { %v2956_v25 = vadd.f32 %v2928_v31, %v2809_v17 }
 0x3bd   :  { %v3117_v23 = vadd.f32 %v4980_v13, %v3097_v39  ;;  %v2639_v39 = vpop.f32.mrf.mxu0  ;;  %v2810_v38 = vadd.f32 %v2784_v7, %v2662_v6 }
 0x3bf   :  { %v3133_v29 = vmax.f32 %v3117_v23, 0.0 }
 0x3c1   :  { %3149 = vst [vmem:[#allocation7 + $0x20] sm:$0xff] %v3133_v29 }
 0x3c2   :  { %v3060_v3 = vpop.f32.mrf.mxu3 }
 0x3c3   :  { %v3098_v51 = vadd.f32 %v3060_v3, %v2951_v62  ;;  %v2931_v55 = vpop.f32.mrf.mxu2  ;;  %v2787_v23 = vpop.f32.mrf.mxu1  ;;  %v2663_v3 = vadd.f32 %v2639_v39, %v4963_v19 }
 0x3c4   :  { %v2957_v29 = vadd.f32 %v2931_v55, %v2810_v38 }
 0x3c5   :  { %v3118_v16 = vadd.f32 %v4980_v13, %v3098_v51  ;;  %v2642_v57 = vpop.f32.mrf.mxu0 }
 0x3c7   :  { %v3134_v46 = vmax.f32 %v3118_v16, 0.0  ;;  %v2811_v16 = vadd.f32 %v2787_v23, %v2663_v3 }
 0x3c9   :  { %3150 = vst [vmem:[#allocation7 + $0x28] sm:$0xff] %v3134_v46 }
 0x3ca   :  { %v3063_v15 = vpop.f32.mrf.mxu3 }
 0x3cb   :  { %v3099_v33 = vadd.f32 %v3063_v15, %v2952_v34  ;;  %v2934_v4 = vpop.f32.mrf.mxu2  ;;  %v2790_v10 = vpop.f32.mrf.mxu1  ;;  %v2664_v34 = vadd.f32 %v2642_v57, %v4968_v28 }
 0x3cc   :  { %v2958_v18 = vadd.f32 %v2934_v4, %v2811_v16 }
 0x3cd   :  { %v3119_v63 = vadd.f32 %v4980_v13, %v3099_v33  ;;  %v2812_v33 = vadd.f32 %v2790_v10, %v2664_v34  ;;  %v2645_v12 = vpop.f32.mrf.mxu0 }
 0x3cf   :  { %v3135_v61 = vmax.f32 %v3119_v63, 0.0 }
 0x3d1   :  { %3151 = vst [vmem:[#allocation7 + $0x30] sm:$0xff] %v3135_v61  ;;  %v2665_v61 = vadd.f32 %v2645_v12, %v4972_v37 }
 0x3d2   :  { %v3066_v1 = vpop.f32.mrf.mxu3 }
 0x3d3   :  { %v3100_v59 = vadd.f32 %v3066_v1, %v2953_v40  ;;  %v2937_v46 = vpop.f32.mrf.mxu2  ;;  %v2793_v35 = vpop.f32.mrf.mxu1 }
 0x3d4   :  { %v2959_v19 = vadd.f32 %v2937_v46, %v2812_v33  ;;  %v2813_v52 = vadd.f32 %v2793_v35, %v2665_v61 }
 0x3d5   :  { %v3120_v0 = vadd.f32 %v4980_v13, %v3100_v59  ;;  %v2648_v28 = vpop.f32.mrf.mxu0 }
 0x3d7   :  { %v3136_v58 = vmax.f32 %v3120_v0, 0.0 }
 0x3d9   :  { %3152 = vst [vmem:[#allocation7 + $0x38] sm:$0xff] %v3136_v58  ;;  %v2666_v58 = vadd.f32 %v2648_v28, %v4975_v14 }
 0x3da   :  { %v3069_v2 = vpop.f32.mrf.mxu3 }
 0x3db   :  { %v3101_v54 = vadd.f32 %v3069_v2, %v2954_v22  ;;  %v2940_v45 = vpop.f32.mrf.mxu2  ;;  %v2796_v22 = vpop.f32.mrf.mxu1 }
 0x3dc   :  { %v2960_v0 = vadd.f32 %v2940_v45, %v2813_v52  ;;  %v2814_v41 = vadd.f32 %v2796_v22, %v2666_v58 }
 0x3dd   :  { %v3121_v26 = vadd.f32 %v4980_v13, %v3101_v54 }
 0x3df   :  { %v3137_v36 = vmax.f32 %v3121_v26, 0.0 }
 0x3e1   :  { %3153 = vst [vmem:[#allocation7 + $0x40] sm:$0xff] %v3137_v36 }
 0x3e2   :  { %v3072_v30 = vpop.f32.mrf.mxu3 }
 0x3e3   :  { %v3102_v43 = vadd.f32 %v3072_v30, %v2955_v42  ;;  %v2943_v56 = vpop.f32.mrf.mxu2 }
 0x3e4   :  { %v2961_v54 = vadd.f32 %v2943_v56, %v2814_v41 }
 0x3e5   :  { %v3122_v49 = vadd.f32 %v4980_v13, %v3102_v43 }
 0x3e7   :  { %v3138_v60 = vmax.f32 %v3122_v49, 0.0 }
 0x3e9   :  { %3154 = vst [vmem:[#allocation7 + $0x48] sm:$0xff] %v3138_v60 }
 0x3ea   :  { %v3075_v20 = vpop.f32.mrf.mxu3 }
 0x3eb   :  { %v3103_v5 = vadd.f32 %v3075_v20, %v2956_v25 }
 0x3ed   :  { %v3123_v44 = vadd.f32 %v4980_v13, %v3103_v5 }
 0x3ef   :  { %v3139_v24 = vmax.f32 %v3123_v44, 0.0 }
 0x3f1   :  { %3155 = vst [vmem:[#allocation7 + $0x50] sm:$0xff] %v3139_v24 }
 0x3f2   :  { %v3078_v62 = vpop.f32.mrf.mxu3 }
 0x3f3   :  { %v3104_v11 = vadd.f32 %v3078_v62, %v2957_v29 }
 0x3f5   :  { %v3124_v51 = vadd.f32 %v4980_v13, %v3104_v11 }
 0x3f7   :  { %v3140_v50 = vmax.f32 %v3124_v51, 0.0 }
 0x3f9   :  { %3156 = vst [vmem:[#allocation7 + $0x58] sm:$0xff] %v3140_v50 }
 0x3fa   :  { %v3081_v9 = vpop.f32.mrf.mxu3 }
 0x3fb   :  { %v3105_v15 = vadd.f32 %v3081_v9, %v2958_v18 }
 0x3fd   :  { %v3125_v47 = vadd.f32 %v4980_v13, %v3105_v15 }
 0x3ff   :  { %v3141_v63 = vmax.f32 %v3125_v47, 0.0 }
 0x401   :  { %3157 = vst [vmem:[#allocation7 + $0x60] sm:$0xff] %v3141_v63 }
 0x402   :  { %v3084_v8 = vpop.f32.mrf.mxu3 }
 0x403   :  { %v3106_v40 = vadd.f32 %v3084_v8, %v2959_v19 }
 0x405   :  { %v3126_v1 = vadd.f32 %v4980_v13, %v3106_v40 }
 0x407   :  { %v3142_v59 = vmax.f32 %v3126_v1, 0.0 }
 0x409   :  { %3158 = vst [vmem:[#allocation7 + $0x68] sm:$0xff] %v3142_v59 }
 0x40a   :  { %v3087_v32 = vpop.f32.mrf.mxu3 }
 0x40b   :  { %v3107_v53 = vadd.f32 %v3087_v32, %v2960_v0 }
 0x40d   :  { %v3127_v2 = vadd.f32 %v4980_v13, %v3107_v53 }
 0x40f   :  { %v3143_v37 = vmax.f32 %v3127_v2, 0.0 }
 0x411   :  { %3159 = vst [vmem:[#allocation7 + $0x70] sm:$0xff] %v3143_v37 }
 0x412   :  { %v3090_v31 = vpop.f32.mrf.mxu3 }
 0x413   :  { %v3108_v26 = vadd.f32 %v3090_v31, %v2961_v54 }
 0x415   :  { %v3128_v48 = vadd.f32 %v4980_v13, %v3108_v26 }
 0x417   :  { %v3144_v14 = vmax.f32 %v3128_v48, 0.0 }
 0x419   :  { %3160 = vst [vmem:[#allocation7 + $0x78] sm:$0xff] %v3144_v14 }
 0x41a   :  { %3173 = dma.vmem_to_hbm [thread:$0]  %s3166_s24, 2048, %s3168_s27, [#allocation6], %s3587_s29, %s3587_s29, %s3588_s30  }
 0x41b   :  { %3584 = dma.done.wait [#allocation6], 2048  }
 0x41c   :  { %3585 = vsyncadd [#allocation6], 4294965248 }
 0x41d   :  { %3178 = vsyncpa [#allocation5], 1 }
 0x41e   :  { %3179 = vsyncpa [#allocation6], 1 }

</bundles_post_ra>
